<compile_context>
chip_gen: v7x
topology: tpu7x:2x2x1
jax: 0.10.0
libtpu: 0.0.40
codegen_flags: <defaults>
</compile_context>

<pallas_src>
import jax
import jax.numpy as jnp
from jax.experimental import pallas as pl
from jax.experimental.pallas import tpu as pltpu


# ----------------------------------------------------------------------------
# Fused kernel: biLSTM recurrence + linear head, one invocation, no grid.
# ----------------------------------------------------------------------------
def tagger_kernel(x_ref, wih_f_ref, whh_f_ref, b_f_ref,
                  wih_b_ref, whh_b_ref, b_b_ref,
                  wlin_f_ref, wlin_b_ref, blin_ref,
                  out_ref, hf_scr, hb_scr):
    B, T, D = x_ref.shape
    H4 = whh_f_ref.shape[-1]
    H = H4 // 4
    O = out_ref.shape[-1]

    # ---- hoisted input projection: one (B*T, D) x (D, 4H) matmul per dir ----
    x2 = x_ref[...].reshape(B * T, D)
    xp_f = (jnp.dot(x2, wih_f_ref[...], preferred_element_type=jnp.float32)
            + b_f_ref[...]).reshape(B, T, H4)
    xp_b = (jnp.dot(x2, wih_b_ref[...], preferred_element_type=jnp.float32)
            + b_b_ref[...]).reshape(B, T, H4)

    whh_f = whh_f_ref[...]
    whh_b = whh_b_ref[...]

    def cell(pre, h, c, whh):
        # pre already contains x @ Wih + (b_ih + b_hh)
        g = pre + jnp.dot(h, whh, preferred_element_type=jnp.float32)  # (B, 4H)
        i = jax.nn.sigmoid(g[:, 0:H])
        f = jax.nn.sigmoid(g[:, H:2 * H])
        gg = jnp.tanh(g[:, 2 * H:3 * H])
        o = jax.nn.sigmoid(g[:, 3 * H:4 * H])
        c = f * c + i * gg
        h = o * jnp.tanh(c)
        return h, c

    zeros = jnp.zeros((B, H), jnp.float32)
    h_f, c_f = zeros, zeros
    h_b, c_b = zeros, zeros

    # Fully static (unrolled) time loop: straight-line code, both directions
    # interleaved per step so their serial dependency chains overlap.
    for t in range(T):
        tb = T - 1 - t
        h_f, c_f = cell(xp_f[:, t, :], h_f, c_f, whh_f)
        h_b, c_b = cell(xp_b[:, tb, :], h_b, c_b, whh_b)
        hf_scr[:, t, :] = h_f
        hb_scr[:, tb, :] = h_b

    # ---- fused linear head: logits = [h_fwd ; h_bwd] @ W_lin^T + b_lin ------
    hf = hf_scr[...].reshape(B * T, H)
    hb = hb_scr[...].reshape(B * T, H)
    y = (jnp.dot(hf, wlin_f_ref[...], preferred_element_type=jnp.float32)
         + jnp.dot(hb, wlin_b_ref[...], preferred_element_type=jnp.float32)
         + blin_ref[...])
    out_ref[...] = y.reshape(B, T, O)


def lstm_tagger_forward(x_btd, params):
    B, T, D = x_btd.shape
    H = params["whh_f"].shape[-1] // 4
    O = params["w_lin_f"].shape[-1]

    vmem_spec = pl.BlockSpec(memory_space=pltpu.MemorySpace.VMEM)
    return pl.pallas_call(
        tagger_kernel,
        out_shape=jax.ShapeDtypeStruct((B, T, O), jnp.float32),
        in_specs=[vmem_spec] * 10,
        out_specs=vmem_spec,
        scratch_shapes=[
            pltpu.VMEM((B, T, H), jnp.float32),   # forward hidden states
            pltpu.VMEM((B, T, H), jnp.float32),   # backward hidden states
        ],
    )(x_btd,
      params["wih_f"], params["whh_f"], params["b_f"],
      params["wih_b"], params["whh_b"], params["b_b"],
      params["w_lin_f"], params["w_lin_b"], params["b_lin"])


# ----------------------------------------------------------------------------
# Pure-JAX reference (for verification)
# ----------------------------------------------------------------------------
def lstm_tagger_reference(x_btd, params):
    B, T, D = x_btd.shape
    H = params["whh_f"].shape[-1] // 4

    def one_dir(x_tbd, wih, whh, b):
        def step(carry, xt):
            h, c = carry
            g = xt @ wih + h @ whh + b              # (B, 4H)
            i = jax.nn.sigmoid(g[:, 0:H])
            f = jax.nn.sigmoid(g[:, H:2 * H])
            gg = jnp.tanh(g[:, 2 * H:3 * H])
            o = jax.nn.sigmoid(g[:, 3 * H:4 * H])
            c = f * c + i * gg
            h = o * jnp.tanh(c)
            return (h, c), h

        init = (jnp.zeros((B, H), jnp.float32), jnp.zeros((B, H), jnp.float32))
        _, hs = jax.lax.scan(step, init, x_tbd)
        return hs                                   # (T, B, H)

    x_tbd = jnp.transpose(x_btd, (1, 0, 2))
    h_f = one_dir(x_tbd, params["wih_f"], params["whh_f"], params["b_f"])
    h_b = one_dir(x_tbd[::-1], params["wih_b"], params["whh_b"],
                  params["b_b"])[::-1]
    h_f = jnp.transpose(h_f, (1, 0, 2))             # (B, T, H)
    h_b = jnp.transpose(h_b, (1, 0, 2))
    return (h_f @ params["w_lin_f"] + h_b @ params["w_lin_b"]
            + params["b_lin"][0])


if __name__ == "__main__":
    B, T, D, H, O = 2, 8, 16, 32, 10   # batch, seq, input_size, hidden, output

    key = jax.random.PRNGKey(0)
    ks = jax.random.split(key, 10)
    bound = 1.0 / jnp.sqrt(jnp.float32(H))

    def u(k_, shape):
        return jax.random.uniform(k_, shape, jnp.float32, -bound, bound)

    params = {
        # forward direction (gate-fused, pre-transposed; b = b_ih + b_hh)
        "wih_f": u(ks[0], (D, 4 * H)),
        "whh_f": u(ks[1], (H, 4 * H)),
        "b_f":   u(ks[2], (1, 4 * H)),
        # reverse direction
        "wih_b": u(ks[3], (D, 4 * H)),
        "whh_b": u(ks[4], (H, 4 * H)),
        "b_b":   u(ks[5], (1, 4 * H)),
        # linear head, split per direction (pre-transposed), bias as (1, O)
        "w_lin_f": u(ks[6], (H, O)),
        "w_lin_b": u(ks[7], (H, O)),
        "b_lin":   u(ks[8], (1, O)),
    }

    x = jax.random.normal(ks[9], (B, T, D), jnp.float32)

    out = jax.block_until_ready(lstm_tagger_forward(x, params))
    ref = jax.block_until_ready(lstm_tagger_reference(x, params))

    assert out.shape == (B, T, O)
    assert jnp.allclose(out, ref, rtol=1e-3, atol=1e-3), "mismatch vs reference"

    print("KERNEL_OK")
</pallas_src>

<mosaic_0001>
module attributes {stable_mosaic.version = 11 : i64} {
  func.func @tagger_kernel(%arg0: memref<2x8x16xf32, #tpu.memory_space<vmem>>, %arg1: memref<16x128xf32, #tpu.memory_space<vmem>>, %arg2: memref<32x128xf32, #tpu.memory_space<vmem>>, %arg3: memref<1x128xf32, #tpu.memory_space<vmem>>, %arg4: memref<16x128xf32, #tpu.memory_space<vmem>>, %arg5: memref<32x128xf32, #tpu.memory_space<vmem>>, %arg6: memref<1x128xf32, #tpu.memory_space<vmem>>, %arg7: memref<32x10xf32, #tpu.memory_space<vmem>>, %arg8: memref<32x10xf32, #tpu.memory_space<vmem>>, %arg9: memref<1x10xf32, #tpu.memory_space<vmem>>, %arg10: memref<2x8x10xf32, #tpu.memory_space<vmem>>, %arg11: memref<2x8x32xf32, #tpu.memory_space<vmem>>, %arg12: memref<2x8x32xf32, #tpu.memory_space<vmem>>) attributes {dimension_semantics = [], scalar_prefetch = 0 : i64, scratch_operands = 2 : i64, tpu.core_type = #tpu.core_type<tc>} {
    %c0 = arith.constant 0 : index
    %c0_0 = arith.constant 0 : index
    %c0_1 = arith.constant 0 : index
    %0 = vector.load %arg0[%c0, %c0_0, %c0_1] : memref<2x8x16xf32, #tpu.memory_space<vmem>>, vector<2x8x16xf32>
    %1 = vector.shape_cast %0 : vector<2x8x16xf32> to vector<16x16xf32>
    %c0_2 = arith.constant 0 : index
    %c0_3 = arith.constant 0 : index
    %2 = vector.load %arg1[%c0_2, %c0_3] : memref<16x128xf32, #tpu.memory_space<vmem>>, vector<16x128xf32>
    %cst = arith.constant dense<0.000000e+00> : vector<16x128xf32>
    %3 = tpu.matmul %1, %2, %cst {dimension_numbers = #tpu.dot_dimension_numbers<[1], [0], [0], [1], [0, 0, 1, 1], [], []>} : vector<16x16xf32>, vector<16x128xf32>, vector<16x128xf32> -> vector<16x128xf32>
    %c0_4 = arith.constant 0 : index
    %c0_5 = arith.constant 0 : index
    %4 = vector.load %arg3[%c0_4, %c0_5] : memref<1x128xf32, #tpu.memory_space<vmem>>, vector<1x128xf32>
    %5 = vector.broadcast %4 : vector<1x128xf32> to vector<16x128xf32>
    %6 = arith.addf %3, %5 : vector<16x128xf32>
    %7 = vector.shape_cast %6 : vector<16x128xf32> to vector<2x8x128xf32>
    %c0_6 = arith.constant 0 : index
    %c0_7 = arith.constant 0 : index
    %8 = vector.load %arg4[%c0_6, %c0_7] : memref<16x128xf32, #tpu.memory_space<vmem>>, vector<16x128xf32>
    %cst_8 = arith.constant dense<0.000000e+00> : vector<16x128xf32>
    %9 = tpu.matmul %1, %8, %cst_8 {dimension_numbers = #tpu.dot_dimension_numbers<[1], [0], [0], [1], [0, 0, 1, 1], [], []>} : vector<16x16xf32>, vector<16x128xf32>, vector<16x128xf32> -> vector<16x128xf32>
    %c0_9 = arith.constant 0 : index
    %c0_10 = arith.constant 0 : index
    %10 = vector.load %arg6[%c0_9, %c0_10] : memref<1x128xf32, #tpu.memory_space<vmem>>, vector<1x128xf32>
    %11 = vector.broadcast %10 : vector<1x128xf32> to vector<16x128xf32>
    %12 = arith.addf %9, %11 : vector<16x128xf32>
    %13 = vector.shape_cast %12 : vector<16x128xf32> to vector<2x8x128xf32>
    %c0_11 = arith.constant 0 : index
    %c0_12 = arith.constant 0 : index
    %14 = vector.load %arg2[%c0_11, %c0_12] : memref<32x128xf32, #tpu.memory_space<vmem>>, vector<32x128xf32>
    %c0_13 = arith.constant 0 : index
    %c0_14 = arith.constant 0 : index
    %15 = vector.load %arg5[%c0_13, %c0_14] : memref<32x128xf32, #tpu.memory_space<vmem>>, vector<32x128xf32>
    %cst_15 = arith.constant 0.000000e+00 : f32
    %16 = vector.broadcast %cst_15 : f32 to vector<2x32xf32>
    %17 = vector.extract_strided_slice %7 {offsets = [0, 0, 0], sizes = [2, 1, 128], strides = [1, 1, 1]} : vector<2x8x128xf32> to vector<2x1x128xf32>
    %18 = vector.shape_cast %17 : vector<2x1x128xf32> to vector<2x128xf32>
    %cst_16 = arith.constant dense<0.000000e+00> : vector<2x128xf32>
    %19 = tpu.matmul %16, %14, %cst_16 {dimension_numbers = #tpu.dot_dimension_numbers<[1], [0], [0], [1], [0, 0, 1, 1], [], []>} : vector<2x32xf32>, vector<32x128xf32>, vector<2x128xf32> -> vector<2x128xf32>
    %20 = arith.addf %18, %19 : vector<2x128xf32>
    %21 = vector.extract_strided_slice %20 {offsets = [0, 0], sizes = [2, 32], strides = [1, 1]} : vector<2x128xf32> to vector<2x32xf32>
    %22 = arith.negf %21 : vector<2x32xf32>
    %23 = math.exp %22 : vector<2x32xf32>
    %cst_17 = arith.constant 1.000000e+00 : f32
    %24 = vector.broadcast %cst_17 : f32 to vector<2x32xf32>
    %25 = arith.addf %24, %23 : vector<2x32xf32>
    %26 = arith.divf %24, %25 : vector<2x32xf32>
    %27 = vector.extract_strided_slice %20 {offsets = [0, 32], sizes = [2, 32], strides = [1, 1]} : vector<2x128xf32> to vector<2x32xf32>
    %28 = arith.negf %27 : vector<2x32xf32>
    %29 = math.exp %28 : vector<2x32xf32>
    %cst_18 = arith.constant 1.000000e+00 : f32
    %30 = vector.broadcast %cst_18 : f32 to vector<2x32xf32>
    %31 = arith.addf %30, %29 : vector<2x32xf32>
    %32 = arith.divf %30, %31 : vector<2x32xf32>
    %33 = vector.extract_strided_slice %20 {offsets = [0, 64], sizes = [2, 32], strides = [1, 1]} : vector<2x128xf32> to vector<2x32xf32>
    %34 = math.tanh %33 : vector<2x32xf32>
    %35 = vector.extract_strided_slice %20 {offsets = [0, 96], sizes = [2, 32], strides = [1, 1]} : vector<2x128xf32> to vector<2x32xf32>
    %36 = arith.negf %35 : vector<2x32xf32>
    %37 = math.exp %36 : vector<2x32xf32>
    %cst_19 = arith.constant 1.000000e+00 : f32
    %38 = vector.broadcast %cst_19 : f32 to vector<2x32xf32>
    %39 = arith.addf %38, %37 : vector<2x32xf32>
    %40 = arith.divf %38, %39 : vector<2x32xf32>
    %41 = arith.mulf %32, %16 : vector<2x32xf32>
    %42 = arith.mulf %26, %34 : vector<2x32xf32>
    %43 = arith.addf %41, %42 : vector<2x32xf32>
    %44 = math.tanh %43 : vector<2x32xf32>
    %45 = arith.mulf %40, %44 : vector<2x32xf32>
    %46 = vector.extract_strided_slice %13 {offsets = [0, 7, 0], sizes = [2, 1, 128], strides = [1, 1, 1]} : vector<2x8x128xf32> to vector<2x1x128xf32>
    %47 = vector.shape_cast %46 : vector<2x1x128xf32> to vector<2x128xf32>
    %cst_20 = arith.constant dense<0.000000e+00> : vector<2x128xf32>
    %48 = tpu.matmul %16, %15, %cst_20 {dimension_numbers = #tpu.dot_dimension_numbers<[1], [0], [0], [1], [0, 0, 1, 1], [], []>} : vector<2x32xf32>, vector<32x128xf32>, vector<2x128xf32> -> vector<2x128xf32>
    %49 = arith.addf %47, %48 : vector<2x128xf32>
    %50 = vector.extract_strided_slice %49 {offsets = [0, 0], sizes = [2, 32], strides = [1, 1]} : vector<2x128xf32> to vector<2x32xf32>
    %51 = arith.negf %50 : vector<2x32xf32>
    %52 = math.exp %51 : vector<2x32xf32>
    %cst_21 = arith.constant 1.000000e+00 : f32
    %53 = vector.broadcast %cst_21 : f32 to vector<2x32xf32>
    %54 = arith.addf %53, %52 : vector<2x32xf32>
    %55 = arith.divf %53, %54 : vector<2x32xf32>
    %56 = vector.extract_strided_slice %49 {offsets = [0, 32], sizes = [2, 32], strides = [1, 1]} : vector<2x128xf32> to vector<2x32xf32>
    %57 = arith.negf %56 : vector<2x32xf32>
    %58 = math.exp %57 : vector<2x32xf32>
    %cst_22 = arith.constant 1.000000e+00 : f32
    %59 = vector.broadcast %cst_22 : f32 to vector<2x32xf32>
    %60 = arith.addf %59, %58 : vector<2x32xf32>
    %61 = arith.divf %59, %60 : vector<2x32xf32>
    %62 = vector.extract_strided_slice %49 {offsets = [0, 64], sizes = [2, 32], strides = [1, 1]} : vector<2x128xf32> to vector<2x32xf32>
    %63 = math.tanh %62 : vector<2x32xf32>
    %64 = vector.extract_strided_slice %49 {offsets = [0, 96], sizes = [2, 32], strides = [1, 1]} : vector<2x128xf32> to vector<2x32xf32>
    %65 = arith.negf %64 : vector<2x32xf32>
    %66 = math.exp %65 : vector<2x32xf32>
    %cst_23 = arith.constant 1.000000e+00 : f32
    %67 = vector.broadcast %cst_23 : f32 to vector<2x32xf32>
    %68 = arith.addf %67, %66 : vector<2x32xf32>
    %69 = arith.divf %67, %68 : vector<2x32xf32>
    %70 = arith.mulf %61, %16 : vector<2x32xf32>
    %71 = arith.mulf %55, %63 : vector<2x32xf32>
    %72 = arith.addf %70, %71 : vector<2x32xf32>
    %73 = math.tanh %72 : vector<2x32xf32>
    %74 = arith.mulf %69, %73 : vector<2x32xf32>
    %c0_24 = arith.constant 0 : index
    %c0_25 = arith.constant 0 : index
    %c0_26 = arith.constant 0 : index
    %75 = vector.load %arg11[%c0_24, %c0_25, %c0_26] : memref<2x8x32xf32, #tpu.memory_space<vmem>>, vector<2x1x32xf32>
    %76 = vector.shape_cast %75 : vector<2x1x32xf32> to vector<2x32xf32>
    %77 = vector.shape_cast %45 : vector<2x32xf32> to vector<2x1x32xf32>
    tpu.vector_store %arg11[%c0_24, %c0_25, %c0_26], %77 {strides = array<i32>} : memref<2x8x32xf32, #tpu.memory_space<vmem>>, vector<2x1x32xf32>,
    %c0_27 = arith.constant 0 : index
    %c7 = arith.constant 7 : index
    %c0_28 = arith.constant 0 : index
    %78 = vector.load %arg12[%c0_27, %c7, %c0_28] : memref<2x8x32xf32, #tpu.memory_space<vmem>>, vector<2x1x32xf32>
    %79 = vector.shape_cast %78 : vector<2x1x32xf32> to vector<2x32xf32>
    %80 = vector.shape_cast %74 : vector<2x32xf32> to vector<2x1x32xf32>
    tpu.vector_store %arg12[%c0_27, %c7, %c0_28], %80 {strides = array<i32>} : memref<2x8x32xf32, #tpu.memory_space<vmem>>, vector<2x1x32xf32>,
    %81 = vector.extract_strided_slice %7 {offsets = [0, 1, 0], sizes = [2, 1, 128], strides = [1, 1, 1]} : vector<2x8x128xf32> to vector<2x1x128xf32>
    %82 = vector.shape_cast %81 : vector<2x1x128xf32> to vector<2x128xf32>
    %cst_29 = arith.constant dense<0.000000e+00> : vector<2x128xf32>
    %83 = tpu.matmul %45, %14, %cst_29 {dimension_numbers = #tpu.dot_dimension_numbers<[1], [0], [0], [1], [0, 0, 1, 1], [], []>} : vector<2x32xf32>, vector<32x128xf32>, vector<2x128xf32> -> vector<2x128xf32>
    %84 = arith.addf %82, %83 : vector<2x128xf32>
    %85 = vector.extract_strided_slice %84 {offsets = [0, 0], sizes = [2, 32], strides = [1, 1]} : vector<2x128xf32> to vector<2x32xf32>
    %86 = arith.negf %85 : vector<2x32xf32>
    %87 = math.exp %86 : vector<2x32xf32>
    %cst_30 = arith.constant 1.000000e+00 : f32
    %88 = vector.broadcast %cst_30 : f32 to vector<2x32xf32>
    %89 = arith.addf %88, %87 : vector<2x32xf32>
    %90 = arith.divf %88, %89 : vector<2x32xf32>
    %91 = vector.extract_strided_slice %84 {offsets = [0, 32], sizes = [2, 32], strides = [1, 1]} : vector<2x128xf32> to vector<2x32xf32>
    %92 = arith.negf %91 : vector<2x32xf32>
    %93 = math.exp %92 : vector<2x32xf32>
    %cst_31 = arith.constant 1.000000e+00 : f32
    %94 = vector.broadcast %cst_31 : f32 to vector<2x32xf32>
    %95 = arith.addf %94, %93 : vector<2x32xf32>
    %96 = arith.divf %94, %95 : vector<2x32xf32>
    %97 = vector.extract_strided_slice %84 {offsets = [0, 64], sizes = [2, 32], strides = [1, 1]} : vector<2x128xf32> to vector<2x32xf32>
    %98 = math.tanh %97 : vector<2x32xf32>
    %99 = vector.extract_strided_slice %84 {offsets = [0, 96], sizes = [2, 32], strides = [1, 1]} : vector<2x128xf32> to vector<2x32xf32>
    %100 = arith.negf %99 : vector<2x32xf32>
    %101 = math.exp %100 : vector<2x32xf32>
    %cst_32 = arith.constant 1.000000e+00 : f32
    %102 = vector.broadcast %cst_32 : f32 to vector<2x32xf32>
    %103 = arith.addf %102, %101 : vector<2x32xf32>
    %104 = arith.divf %102, %103 : vector<2x32xf32>
    %105 = arith.mulf %96, %43 : vector<2x32xf32>
    %106 = arith.mulf %90, %98 : vector<2x32xf32>
    %107 = arith.addf %105, %106 : vector<2x32xf32>
    %108 = math.tanh %107 : vector<2x32xf32>
    %109 = arith.mulf %104, %108 : vector<2x32xf32>
    %110 = vector.extract_strided_slice %13 {offsets = [0, 6, 0], sizes = [2, 1, 128], strides = [1, 1, 1]} : vector<2x8x128xf32> to vector<2x1x128xf32>
    %111 = vector.shape_cast %110 : vector<2x1x128xf32> to vector<2x128xf32>
    %cst_33 = arith.constant dense<0.000000e+00> : vector<2x128xf32>
    %112 = tpu.matmul %74, %15, %cst_33 {dimension_numbers = #tpu.dot_dimension_numbers<[1], [0], [0], [1], [0, 0, 1, 1], [], []>} : vector<2x32xf32>, vector<32x128xf32>, vector<2x128xf32> -> vector<2x128xf32>
    %113 = arith.addf %111, %112 : vector<2x128xf32>
    %114 = vector.extract_strided_slice %113 {offsets = [0, 0], sizes = [2, 32], strides = [1, 1]} : vector<2x128xf32> to vector<2x32xf32>
    %115 = arith.negf %114 : vector<2x32xf32>
    %116 = math.exp %115 : vector<2x32xf32>
    %cst_34 = arith.constant 1.000000e+00 : f32
    %117 = vector.broadcast %cst_34 : f32 to vector<2x32xf32>
    %118 = arith.addf %117, %116 : vector<2x32xf32>
    %119 = arith.divf %117, %118 : vector<2x32xf32>
    %120 = vector.extract_strided_slice %113 {offsets = [0, 32], sizes = [2, 32], strides = [1, 1]} : vector<2x128xf32> to vector<2x32xf32>
    %121 = arith.negf %120 : vector<2x32xf32>
    %122 = math.exp %121 : vector<2x32xf32>
    %cst_35 = arith.constant 1.000000e+00 : f32
    %123 = vector.broadcast %cst_35 : f32 to vector<2x32xf32>
    %124 = arith.addf %123, %122 : vector<2x32xf32>
    %125 = arith.divf %123, %124 : vector<2x32xf32>
    %126 = vector.extract_strided_slice %113 {offsets = [0, 64], sizes = [2, 32], strides = [1, 1]} : vector<2x128xf32> to vector<2x32xf32>
    %127 = math.tanh %126 : vector<2x32xf32>
    %128 = vector.extract_strided_slice %113 {offsets = [0, 96], sizes = [2, 32], strides = [1, 1]} : vector<2x128xf32> to vector<2x32xf32>
    %129 = arith.negf %128 : vector<2x32xf32>
    %130 = math.exp %129 : vector<2x32xf32>
    %cst_36 = arith.constant 1.000000e+00 : f32
    %131 = vector.broadcast %cst_36 : f32 to vector<2x32xf32>
    %132 = arith.addf %131, %130 : vector<2x32xf32>
    %133 = arith.divf %131, %132 : vector<2x32xf32>
    %134 = arith.mulf %125, %72 : vector<2x32xf32>
    %135 = arith.mulf %119, %127 : vector<2x32xf32>
    %136 = arith.addf %134, %135 : vector<2x32xf32>
    %137 = math.tanh %136 : vector<2x32xf32>
    %138 = arith.mulf %133, %137 : vector<2x32xf32>
    %c0_37 = arith.constant 0 : index
    %c1 = arith.constant 1 : index
    %c0_38 = arith.constant 0 : index
    %139 = vector.load %arg11[%c0_37, %c1, %c0_38] : memref<2x8x32xf32, #tpu.memory_space<vmem>>, vector<2x1x32xf32>
    %140 = vector.shape_cast %139 : vector<2x1x32xf32> to vector<2x32xf32>
    %141 = vector.shape_cast %109 : vector<2x32xf32> to vector<2x1x32xf32>
    tpu.vector_store %arg11[%c0_37, %c1, %c0_38], %141 {strides = array<i32>} : memref<2x8x32xf32, #tpu.memory_space<vmem>>, vector<2x1x32xf32>,
    %c0_39 = arith.constant 0 : index
    %c6 = arith.constant 6 : index
    %c0_40 = arith.constant 0 : index
    %142 = vector.load %arg12[%c0_39, %c6, %c0_40] : memref<2x8x32xf32, #tpu.memory_space<vmem>>, vector<2x1x32xf32>
    %143 = vector.shape_cast %142 : vector<2x1x32xf32> to vector<2x32xf32>
    %144 = vector.shape_cast %138 : vector<2x32xf32> to vector<2x1x32xf32>
    tpu.vector_store %arg12[%c0_39, %c6, %c0_40], %144 {strides = array<i32>} : memref<2x8x32xf32, #tpu.memory_space<vmem>>, vector<2x1x32xf32>,
    %145 = vector.extract_strided_slice %7 {offsets = [0, 2, 0], sizes = [2, 1, 128], strides = [1, 1, 1]} : vector<2x8x128xf32> to vector<2x1x128xf32>
    %146 = vector.shape_cast %145 : vector<2x1x128xf32> to vector<2x128xf32>
    %cst_41 = arith.constant dense<0.000000e+00> : vector<2x128xf32>
    %147 = tpu.matmul %109, %14, %cst_41 {dimension_numbers = #tpu.dot_dimension_numbers<[1], [0], [0], [1], [0, 0, 1, 1], [], []>} : vector<2x32xf32>, vector<32x128xf32>, vector<2x128xf32> -> vector<2x128xf32>
    %148 = arith.addf %146, %147 : vector<2x128xf32>
    %149 = vector.extract_strided_slice %148 {offsets = [0, 0], sizes = [2, 32], strides = [1, 1]} : vector<2x128xf32> to vector<2x32xf32>
    %150 = arith.negf %149 : vector<2x32xf32>
    %151 = math.exp %150 : vector<2x32xf32>
    %cst_42 = arith.constant 1.000000e+00 : f32
    %152 = vector.broadcast %cst_42 : f32 to vector<2x32xf32>
    %153 = arith.addf %152, %151 : vector<2x32xf32>
    %154 = arith.divf %152, %153 : vector<2x32xf32>
    %155 = vector.extract_strided_slice %148 {offsets = [0, 32], sizes = [2, 32], strides = [1, 1]} : vector<2x128xf32> to vector<2x32xf32>
    %156 = arith.negf %155 : vector<2x32xf32>
    %157 = math.exp %156 : vector<2x32xf32>
    %cst_43 = arith.constant 1.000000e+00 : f32
    %158 = vector.broadcast %cst_43 : f32 to vector<2x32xf32>
    %159 = arith.addf %158, %157 : vector<2x32xf32>
    %160 = arith.divf %158, %159 : vector<2x32xf32>
    %161 = vector.extract_strided_slice %148 {offsets = [0, 64], sizes = [2, 32], strides = [1, 1]} : vector<2x128xf32> to vector<2x32xf32>
    %162 = math.tanh %161 : vector<2x32xf32>
    %163 = vector.extract_strided_slice %148 {offsets = [0, 96], sizes = [2, 32], strides = [1, 1]} : vector<2x128xf32> to vector<2x32xf32>
    %164 = arith.negf %163 : vector<2x32xf32>
    %165 = math.exp %164 : vector<2x32xf32>
    %cst_44 = arith.constant 1.000000e+00 : f32
    %166 = vector.broadcast %cst_44 : f32 to vector<2x32xf32>
    %167 = arith.addf %166, %165 : vector<2x32xf32>
    %168 = arith.divf %166, %167 : vector<2x32xf32>
    %169 = arith.mulf %160, %107 : vector<2x32xf32>
    %170 = arith.mulf %154, %162 : vector<2x32xf32>
    %171 = arith.addf %169, %170 : vector<2x32xf32>
    %172 = math.tanh %171 : vector<2x32xf32>
    %173 = arith.mulf %168, %172 : vector<2x32xf32>
    %174 = vector.extract_strided_slice %13 {offsets = [0, 5, 0], sizes = [2, 1, 128], strides = [1, 1, 1]} : vector<2x8x128xf32> to vector<2x1x128xf32>
    %175 = vector.shape_cast %174 : vector<2x1x128xf32> to vector<2x128xf32>
    %cst_45 = arith.constant dense<0.000000e+00> : vector<2x128xf32>
    %176 = tpu.matmul %138, %15, %cst_45 {dimension_numbers = #tpu.dot_dimension_numbers<[1], [0], [0], [1], [0, 0, 1, 1], [], []>} : vector<2x32xf32>, vector<32x128xf32>, vector<2x128xf32> -> vector<2x128xf32>
    %177 = arith.addf %175, %176 : vector<2x128xf32>
    %178 = vector.extract_strided_slice %177 {offsets = [0, 0], sizes = [2, 32], strides = [1, 1]} : vector<2x128xf32> to vector<2x32xf32>
    %179 = arith.negf %178 : vector<2x32xf32>
    %180 = math.exp %179 : vector<2x32xf32>
    %cst_46 = arith.constant 1.000000e+00 : f32
    %181 = vector.broadcast %cst_46 : f32 to vector<2x32xf32>
    %182 = arith.addf %181, %180 : vector<2x32xf32>
    %183 = arith.divf %181, %182 : vector<2x32xf32>
    %184 = vector.extract_strided_slice %177 {offsets = [0, 32], sizes = [2, 32], strides = [1, 1]} : vector<2x128xf32> to vector<2x32xf32>
    %185 = arith.negf %184 : vector<2x32xf32>
    %186 = math.exp %185 : vector<2x32xf32>
    %cst_47 = arith.constant 1.000000e+00 : f32
    %187 = vector.broadcast %cst_47 : f32 to vector<2x32xf32>
    %188 = arith.addf %187, %186 : vector<2x32xf32>
    %189 = arith.divf %187, %188 : vector<2x32xf32>
    %190 = vector.extract_strided_slice %177 {offsets = [0, 64], sizes = [2, 32], strides = [1, 1]} : vector<2x128xf32> to vector<2x32xf32>
    %191 = math.tanh %190 : vector<2x32xf32>
    %192 = vector.extract_strided_slice %177 {offsets = [0, 96], sizes = [2, 32], strides = [1, 1]} : vector<2x128xf32> to vector<2x32xf32>
    %193 = arith.negf %192 : vector<2x32xf32>
    %194 = math.exp %193 : vector<2x32xf32>
    %cst_48 = arith.constant 1.000000e+00 : f32
    %195 = vector.broadcast %cst_48 : f32 to vector<2x32xf32>
    %196 = arith.addf %195, %194 : vector<2x32xf32>
    %197 = arith.divf %195, %196 : vector<2x32xf32>
    %198 = arith.mulf %189, %136 : vector<2x32xf32>
    %199 = arith.mulf %183, %191 : vector<2x32xf32>
    %200 = arith.addf %198, %199 : vector<2x32xf32>
    %201 = math.tanh %200 : vector<2x32xf32>
    %202 = arith.mulf %197, %201 : vector<2x32xf32>
    %c0_49 = arith.constant 0 : index
    %c2 = arith.constant 2 : index
    %c0_50 = arith.constant 0 : index
    %203 = vector.load %arg11[%c0_49, %c2, %c0_50] : memref<2x8x32xf32, #tpu.memory_space<vmem>>, vector<2x1x32xf32>
    %204 = vector.shape_cast %203 : vector<2x1x32xf32> to vector<2x32xf32>
    %205 = vector.shape_cast %173 : vector<2x32xf32> to vector<2x1x32xf32>
    tpu.vector_store %arg11[%c0_49, %c2, %c0_50], %205 {strides = array<i32>} : memref<2x8x32xf32, #tpu.memory_space<vmem>>, vector<2x1x32xf32>,
    %c0_51 = arith.constant 0 : index
    %c5 = arith.constant 5 : index
    %c0_52 = arith.constant 0 : index
    %206 = vector.load %arg12[%c0_51, %c5, %c0_52] : memref<2x8x32xf32, #tpu.memory_space<vmem>>, vector<2x1x32xf32>
    %207 = vector.shape_cast %206 : vector<2x1x32xf32> to vector<2x32xf32>
    %208 = vector.shape_cast %202 : vector<2x32xf32> to vector<2x1x32xf32>
    tpu.vector_store %arg12[%c0_51, %c5, %c0_52], %208 {strides = array<i32>} : memref<2x8x32xf32, #tpu.memory_space<vmem>>, vector<2x1x32xf32>,
    %209 = vector.extract_strided_slice %7 {offsets = [0, 3, 0], sizes = [2, 1, 128], strides = [1, 1, 1]} : vector<2x8x128xf32> to vector<2x1x128xf32>
    %210 = vector.shape_cast %209 : vector<2x1x128xf32> to vector<2x128xf32>
    %cst_53 = arith.constant dense<0.000000e+00> : vector<2x128xf32>
    %211 = tpu.matmul %173, %14, %cst_53 {dimension_numbers = #tpu.dot_dimension_numbers<[1], [0], [0], [1], [0, 0, 1, 1], [], []>} : vector<2x32xf32>, vector<32x128xf32>, vector<2x128xf32> -> vector<2x128xf32>
    %212 = arith.addf %210, %211 : vector<2x128xf32>
    %213 = vector.extract_strided_slice %212 {offsets = [0, 0], sizes = [2, 32], strides = [1, 1]} : vector<2x128xf32> to vector<2x32xf32>
    %214 = arith.negf %213 : vector<2x32xf32>
    %215 = math.exp %214 : vector<2x32xf32>
    %cst_54 = arith.constant 1.000000e+00 : f32
    %216 = vector.broadcast %cst_54 : f32 to vector<2x32xf32>
    %217 = arith.addf %216, %215 : vector<2x32xf32>
    %218 = arith.divf %216, %217 : vector<2x32xf32>
    %219 = vector.extract_strided_slice %212 {offsets = [0, 32], sizes = [2, 32], strides = [1, 1]} : vector<2x128xf32> to vector<2x32xf32>
    %220 = arith.negf %219 : vector<2x32xf32>
    %221 = math.exp %220 : vector<2x32xf32>
    %cst_55 = arith.constant 1.000000e+00 : f32
    %222 = vector.broadcast %cst_55 : f32 to vector<2x32xf32>
    %223 = arith.addf %222, %221 : vector<2x32xf32>
    %224 = arith.divf %222, %223 : vector<2x32xf32>
    %225 = vector.extract_strided_slice %212 {offsets = [0, 64], sizes = [2, 32], strides = [1, 1]} : vector<2x128xf32> to vector<2x32xf32>
    %226 = math.tanh %225 : vector<2x32xf32>
    %227 = vector.extract_strided_slice %212 {offsets = [0, 96], sizes = [2, 32], strides = [1, 1]} : vector<2x128xf32> to vector<2x32xf32>
    %228 = arith.negf %227 : vector<2x32xf32>
    %229 = math.exp %228 : vector<2x32xf32>
    %cst_56 = arith.constant 1.000000e+00 : f32
    %230 = vector.broadcast %cst_56 : f32 to vector<2x32xf32>
    %231 = arith.addf %230, %229 : vector<2x32xf32>
    %232 = arith.divf %230, %231 : vector<2x32xf32>
    %233 = arith.mulf %224, %171 : vector<2x32xf32>
    %234 = arith.mulf %218, %226 : vector<2x32xf32>
    %235 = arith.addf %233, %234 : vector<2x32xf32>
    %236 = math.tanh %235 : vector<2x32xf32>
    %237 = arith.mulf %232, %236 : vector<2x32xf32>
    %238 = vector.extract_strided_slice %13 {offsets = [0, 4, 0], sizes = [2, 1, 128], strides = [1, 1, 1]} : vector<2x8x128xf32> to vector<2x1x128xf32>
    %239 = vector.shape_cast %238 : vector<2x1x128xf32> to vector<2x128xf32>
    %cst_57 = arith.constant dense<0.000000e+00> : vector<2x128xf32>
    %240 = tpu.matmul %202, %15, %cst_57 {dimension_numbers = #tpu.dot_dimension_numbers<[1], [0], [0], [1], [0, 0, 1, 1], [], []>} : vector<2x32xf32>, vector<32x128xf32>, vector<2x128xf32> -> vector<2x128xf32>
    %241 = arith.addf %239, %240 : vector<2x128xf32>
    %242 = vector.extract_strided_slice %241 {offsets = [0, 0], sizes = [2, 32], strides = [1, 1]} : vector<2x128xf32> to vector<2x32xf32>
    %243 = arith.negf %242 : vector<2x32xf32>
    %244 = math.exp %243 : vector<2x32xf32>
    %cst_58 = arith.constant 1.000000e+00 : f32
    %245 = vector.broadcast %cst_58 : f32 to vector<2x32xf32>
    %246 = arith.addf %245, %244 : vector<2x32xf32>
    %247 = arith.divf %245, %246 : vector<2x32xf32>
    %248 = vector.extract_strided_slice %241 {offsets = [0, 32], sizes = [2, 32], strides = [1, 1]} : vector<2x128xf32> to vector<2x32xf32>
    %249 = arith.negf %248 : vector<2x32xf32>
    %250 = math.exp %249 : vector<2x32xf32>
    %cst_59 = arith.constant 1.000000e+00 : f32
    %251 = vector.broadcast %cst_59 : f32 to vector<2x32xf32>
    %252 = arith.addf %251, %250 : vector<2x32xf32>
    %253 = arith.divf %251, %252 : vector<2x32xf32>
    %254 = vector.extract_strided_slice %241 {offsets = [0, 64], sizes = [2, 32], strides = [1, 1]} : vector<2x128xf32> to vector<2x32xf32>
    %255 = math.tanh %254 : vector<2x32xf32>
    %256 = vector.extract_strided_slice %241 {offsets = [0, 96], sizes = [2, 32], strides = [1, 1]} : vector<2x128xf32> to vector<2x32xf32>
    %257 = arith.negf %256 : vector<2x32xf32>
    %258 = math.exp %257 : vector<2x32xf32>
    %cst_60 = arith.constant 1.000000e+00 : f32
    %259 = vector.broadcast %cst_60 : f32 to vector<2x32xf32>
    %260 = arith.addf %259, %258 : vector<2x32xf32>
    %261 = arith.divf %259, %260 : vector<2x32xf32>
    %262 = arith.mulf %253, %200 : vector<2x32xf32>
    %263 = arith.mulf %247, %255 : vector<2x32xf32>
    %264 = arith.addf %262, %263 : vector<2x32xf32>
    %265 = math.tanh %264 : vector<2x32xf32>
    %266 = arith.mulf %261, %265 : vector<2x32xf32>
    %c0_61 = arith.constant 0 : index
    %c3 = arith.constant 3 : index
    %c0_62 = arith.constant 0 : index
    %267 = vector.load %arg11[%c0_61, %c3, %c0_62] : memref<2x8x32xf32, #tpu.memory_space<vmem>>, vector<2x1x32xf32>
    %268 = vector.shape_cast %267 : vector<2x1x32xf32> to vector<2x32xf32>
    %269 = vector.shape_cast %237 : vector<2x32xf32> to vector<2x1x32xf32>
    tpu.vector_store %arg11[%c0_61, %c3, %c0_62], %269 {strides = array<i32>} : memref<2x8x32xf32, #tpu.memory_space<vmem>>, vector<2x1x32xf32>,
    %c0_63 = arith.constant 0 : index
    %c4 = arith.constant 4 : index
    %c0_64 = arith.constant 0 : index
    %270 = vector.load %arg12[%c0_63, %c4, %c0_64] : memref<2x8x32xf32, #tpu.memory_space<vmem>>, vector<2x1x32xf32>
    %271 = vector.shape_cast %270 : vector<2x1x32xf32> to vector<2x32xf32>
    %272 = vector.shape_cast %266 : vector<2x32xf32> to vector<2x1x32xf32>
    tpu.vector_store %arg12[%c0_63, %c4, %c0_64], %272 {strides = array<i32>} : memref<2x8x32xf32, #tpu.memory_space<vmem>>, vector<2x1x32xf32>,
    %273 = vector.extract_strided_slice %7 {offsets = [0, 4, 0], sizes = [2, 1, 128], strides = [1, 1, 1]} : vector<2x8x128xf32> to vector<2x1x128xf32>
    %274 = vector.shape_cast %273 : vector<2x1x128xf32> to vector<2x128xf32>
    %cst_65 = arith.constant dense<0.000000e+00> : vector<2x128xf32>
    %275 = tpu.matmul %237, %14, %cst_65 {dimension_numbers = #tpu.dot_dimension_numbers<[1], [0], [0], [1], [0, 0, 1, 1], [], []>} : vector<2x32xf32>, vector<32x128xf32>, vector<2x128xf32> -> vector<2x128xf32>
    %276 = arith.addf %274, %275 : vector<2x128xf32>
    %277 = vector.extract_strided_slice %276 {offsets = [0, 0], sizes = [2, 32], strides = [1, 1]} : vector<2x128xf32> to vector<2x32xf32>
    %278 = arith.negf %277 : vector<2x32xf32>
    %279 = math.exp %278 : vector<2x32xf32>
    %cst_66 = arith.constant 1.000000e+00 : f32
    %280 = vector.broadcast %cst_66 : f32 to vector<2x32xf32>
    %281 = arith.addf %280, %279 : vector<2x32xf32>
    %282 = arith.divf %280, %281 : vector<2x32xf32>
    %283 = vector.extract_strided_slice %276 {offsets = [0, 32], sizes = [2, 32], strides = [1, 1]} : vector<2x128xf32> to vector<2x32xf32>
    %284 = arith.negf %283 : vector<2x32xf32>
    %285 = math.exp %284 : vector<2x32xf32>
    %cst_67 = arith.constant 1.000000e+00 : f32
    %286 = vector.broadcast %cst_67 : f32 to vector<2x32xf32>
    %287 = arith.addf %286, %285 : vector<2x32xf32>
    %288 = arith.divf %286, %287 : vector<2x32xf32>
    %289 = vector.extract_strided_slice %276 {offsets = [0, 64], sizes = [2, 32], strides = [1, 1]} : vector<2x128xf32> to vector<2x32xf32>
    %290 = math.tanh %289 : vector<2x32xf32>
    %291 = vector.extract_strided_slice %276 {offsets = [0, 96], sizes = [2, 32], strides = [1, 1]} : vector<2x128xf32> to vector<2x32xf32>
    %292 = arith.negf %291 : vector<2x32xf32>
    %293 = math.exp %292 : vector<2x32xf32>
    %cst_68 = arith.constant 1.000000e+00 : f32
    %294 = vector.broadcast %cst_68 : f32 to vector<2x32xf32>
    %295 = arith.addf %294, %293 : vector<2x32xf32>
    %296 = arith.divf %294, %295 : vector<2x32xf32>
    %297 = arith.mulf %288, %235 : vector<2x32xf32>
    %298 = arith.mulf %282, %290 : vector<2x32xf32>
    %299 = arith.addf %297, %298 : vector<2x32xf32>
    %300 = math.tanh %299 : vector<2x32xf32>
    %301 = arith.mulf %296, %300 : vector<2x32xf32>
    %302 = vector.extract_strided_slice %13 {offsets = [0, 3, 0], sizes = [2, 1, 128], strides = [1, 1, 1]} : vector<2x8x128xf32> to vector<2x1x128xf32>
    %303 = vector.shape_cast %302 : vector<2x1x128xf32> to vector<2x128xf32>
    %cst_69 = arith.constant dense<0.000000e+00> : vector<2x128xf32>
    %304 = tpu.matmul %266, %15, %cst_69 {dimension_numbers = #tpu.dot_dimension_numbers<[1], [0], [0], [1], [0, 0, 1, 1], [], []>} : vector<2x32xf32>, vector<32x128xf32>, vector<2x128xf32> -> vector<2x128xf32>
    %305 = arith.addf %303, %304 : vector<2x128xf32>
    %306 = vector.extract_strided_slice %305 {offsets = [0, 0], sizes = [2, 32], strides = [1, 1]} : vector<2x128xf32> to vector<2x32xf32>
    %307 = arith.negf %306 : vector<2x32xf32>
    %308 = math.exp %307 : vector<2x32xf32>
    %cst_70 = arith.constant 1.000000e+00 : f32
    %309 = vector.broadcast %cst_70 : f32 to vector<2x32xf32>
    %310 = arith.addf %309, %308 : vector<2x32xf32>
    %311 = arith.divf %309, %310 : vector<2x32xf32>
    %312 = vector.extract_strided_slice %305 {offsets = [0, 32], sizes = [2, 32], strides = [1, 1]} : vector<2x128xf32> to vector<2x32xf32>
    %313 = arith.negf %312 : vector<2x32xf32>
    %314 = math.exp %313 : vector<2x32xf32>
    %cst_71 = arith.constant 1.000000e+00 : f32
    %315 = vector.broadcast %cst_71 : f32 to vector<2x32xf32>
    %316 = arith.addf %315, %314 : vector<2x32xf32>
    %317 = arith.divf %315, %316 : vector<2x32xf32>
    %318 = vector.extract_strided_slice %305 {offsets = [0, 64], sizes = [2, 32], strides = [1, 1]} : vector<2x128xf32> to vector<2x32xf32>
    %319 = math.tanh %318 : vector<2x32xf32>
    %320 = vector.extract_strided_slice %305 {offsets = [0, 96], sizes = [2, 32], strides = [1, 1]} : vector<2x128xf32> to vector<2x32xf32>
    %321 = arith.negf %320 : vector<2x32xf32>
    %322 = math.exp %321 : vector<2x32xf32>
    %cst_72 = arith.constant 1.000000e+00 : f32
    %323 = vector.broadcast %cst_72 : f32 to vector<2x32xf32>
    %324 = arith.addf %323, %322 : vector<2x32xf32>
    %325 = arith.divf %323, %324 : vector<2x32xf32>
    %326 = arith.mulf %317, %264 : vector<2x32xf32>
    %327 = arith.mulf %311, %319 : vector<2x32xf32>
    %328 = arith.addf %326, %327 : vector<2x32xf32>
    %329 = math.tanh %328 : vector<2x32xf32>
    %330 = arith.mulf %325, %329 : vector<2x32xf32>
    %c0_73 = arith.constant 0 : index
    %c4_74 = arith.constant 4 : index
    %c0_75 = arith.constant 0 : index
    %331 = vector.load %arg11[%c0_73, %c4_74, %c0_75] : memref<2x8x32xf32, #tpu.memory_space<vmem>>, vector<2x1x32xf32>
    %332 = vector.shape_cast %331 : vector<2x1x32xf32> to vector<2x32xf32>
    %333 = vector.shape_cast %301 : vector<2x32xf32> to vector<2x1x32xf32>
    tpu.vector_store %arg11[%c0_73, %c4_74, %c0_75], %333 {strides = array<i32>} : memref<2x8x32xf32, #tpu.memory_space<vmem>>, vector<2x1x32xf32>,
    %c0_76 = arith.constant 0 : index
    %c3_77 = arith.constant 3 : index
    %c0_78 = arith.constant 0 : index
    %334 = vector.load %arg12[%c0_76, %c3_77, %c0_78] : memref<2x8x32xf32, #tpu.memory_space<vmem>>, vector<2x1x32xf32>
    %335 = vector.shape_cast %334 : vector<2x1x32xf32> to vector<2x32xf32>
    %336 = vector.shape_cast %330 : vector<2x32xf32> to vector<2x1x32xf32>
    tpu.vector_store %arg12[%c0_76, %c3_77, %c0_78], %336 {strides = array<i32>} : memref<2x8x32xf32, #tpu.memory_space<vmem>>, vector<2x1x32xf32>,
    %337 = vector.extract_strided_slice %7 {offsets = [0, 5, 0], sizes = [2, 1, 128], strides = [1, 1, 1]} : vector<2x8x128xf32> to vector<2x1x128xf32>
    %338 = vector.shape_cast %337 : vector<2x1x128xf32> to vector<2x128xf32>
    %cst_79 = arith.constant dense<0.000000e+00> : vector<2x128xf32>
    %339 = tpu.matmul %301, %14, %cst_79 {dimension_numbers = #tpu.dot_dimension_numbers<[1], [0], [0], [1], [0, 0, 1, 1], [], []>} : vector<2x32xf32>, vector<32x128xf32>, vector<2x128xf32> -> vector<2x128xf32>
    %340 = arith.addf %338, %339 : vector<2x128xf32>
    %341 = vector.extract_strided_slice %340 {offsets = [0, 0], sizes = [2, 32], strides = [1, 1]} : vector<2x128xf32> to vector<2x32xf32>
    %342 = arith.negf %341 : vector<2x32xf32>
    %343 = math.exp %342 : vector<2x32xf32>
    %cst_80 = arith.constant 1.000000e+00 : f32
    %344 = vector.broadcast %cst_80 : f32 to vector<2x32xf32>
    %345 = arith.addf %344, %343 : vector<2x32xf32>
    %346 = arith.divf %344, %345 : vector<2x32xf32>
    %347 = vector.extract_strided_slice %340 {offsets = [0, 32], sizes = [2, 32], strides = [1, 1]} : vector<2x128xf32> to vector<2x32xf32>
    %348 = arith.negf %347 : vector<2x32xf32>
    %349 = math.exp %348 : vector<2x32xf32>
    %cst_81 = arith.constant 1.000000e+00 : f32
    %350 = vector.broadcast %cst_81 : f32 to vector<2x32xf32>
    %351 = arith.addf %350, %349 : vector<2x32xf32>
    %352 = arith.divf %350, %351 : vector<2x32xf32>
    %353 = vector.extract_strided_slice %340 {offsets = [0, 64], sizes = [2, 32], strides = [1, 1]} : vector<2x128xf32> to vector<2x32xf32>
    %354 = math.tanh %353 : vector<2x32xf32>
    %355 = vector.extract_strided_slice %340 {offsets = [0, 96], sizes = [2, 32], strides = [1, 1]} : vector<2x128xf32> to vector<2x32xf32>
    %356 = arith.negf %355 : vector<2x32xf32>
    %357 = math.exp %356 : vector<2x32xf32>
    %cst_82 = arith.constant 1.000000e+00 : f32
    %358 = vector.broadcast %cst_82 : f32 to vector<2x32xf32>
    %359 = arith.addf %358, %357 : vector<2x32xf32>
    %360 = arith.divf %358, %359 : vector<2x32xf32>
    %361 = arith.mulf %352, %299 : vector<2x32xf32>
    %362 = arith.mulf %346, %354 : vector<2x32xf32>
    %363 = arith.addf %361, %362 : vector<2x32xf32>
    %364 = math.tanh %363 : vector<2x32xf32>
    %365 = arith.mulf %360, %364 : vector<2x32xf32>
    %366 = vector.extract_strided_slice %13 {offsets = [0, 2, 0], sizes = [2, 1, 128], strides = [1, 1, 1]} : vector<2x8x128xf32> to vector<2x1x128xf32>
    %367 = vector.shape_cast %366 : vector<2x1x128xf32> to vector<2x128xf32>
    %cst_83 = arith.constant dense<0.000000e+00> : vector<2x128xf32>
    %368 = tpu.matmul %330, %15, %cst_83 {dimension_numbers = #tpu.dot_dimension_numbers<[1], [0], [0], [1], [0, 0, 1, 1], [], []>} : vector<2x32xf32>, vector<32x128xf32>, vector<2x128xf32> -> vector<2x128xf32>
    %369 = arith.addf %367, %368 : vector<2x128xf32>
    %370 = vector.extract_strided_slice %369 {offsets = [0, 0], sizes = [2, 32], strides = [1, 1]} : vector<2x128xf32> to vector<2x32xf32>
    %371 = arith.negf %370 : vector<2x32xf32>
    %372 = math.exp %371 : vector<2x32xf32>
    %cst_84 = arith.constant 1.000000e+00 : f32
    %373 = vector.broadcast %cst_84 : f32 to vector<2x32xf32>
    %374 = arith.addf %373, %372 : vector<2x32xf32>
    %375 = arith.divf %373, %374 : vector<2x32xf32>
    %376 = vector.extract_strided_slice %369 {offsets = [0, 32], sizes = [2, 32], strides = [1, 1]} : vector<2x128xf32> to vector<2x32xf32>
    %377 = arith.negf %376 : vector<2x32xf32>
    %378 = math.exp %377 : vector<2x32xf32>
    %cst_85 = arith.constant 1.000000e+00 : f32
    %379 = vector.broadcast %cst_85 : f32 to vector<2x32xf32>
    %380 = arith.addf %379, %378 : vector<2x32xf32>
    %381 = arith.divf %379, %380 : vector<2x32xf32>
    %382 = vector.extract_strided_slice %369 {offsets = [0, 64], sizes = [2, 32], strides = [1, 1]} : vector<2x128xf32> to vector<2x32xf32>
    %383 = math.tanh %382 : vector<2x32xf32>
    %384 = vector.extract_strided_slice %369 {offsets = [0, 96], sizes = [2, 32], strides = [1, 1]} : vector<2x128xf32> to vector<2x32xf32>
    %385 = arith.negf %384 : vector<2x32xf32>
    %386 = math.exp %385 : vector<2x32xf32>
    %cst_86 = arith.constant 1.000000e+00 : f32
    %387 = vector.broadcast %cst_86 : f32 to vector<2x32xf32>
    %388 = arith.addf %387, %386 : vector<2x32xf32>
    %389 = arith.divf %387, %388 : vector<2x32xf32>
    %390 = arith.mulf %381, %328 : vector<2x32xf32>
    %391 = arith.mulf %375, %383 : vector<2x32xf32>
    %392 = arith.addf %390, %391 : vector<2x32xf32>
    %393 = math.tanh %392 : vector<2x32xf32>
    %394 = arith.mulf %389, %393 : vector<2x32xf32>
    %c0_87 = arith.constant 0 : index
    %c5_88 = arith.constant 5 : index
    %c0_89 = arith.constant 0 : index
    %395 = vector.load %arg11[%c0_87, %c5_88, %c0_89] : memref<2x8x32xf32, #tpu.memory_space<vmem>>, vector<2x1x32xf32>
    %396 = vector.shape_cast %395 : vector<2x1x32xf32> to vector<2x32xf32>
    %397 = vector.shape_cast %365 : vector<2x32xf32> to vector<2x1x32xf32>
    tpu.vector_store %arg11[%c0_87, %c5_88, %c0_89], %397 {strides = array<i32>} : memref<2x8x32xf32, #tpu.memory_space<vmem>>, vector<2x1x32xf32>,
    %c0_90 = arith.constant 0 : index
    %c2_91 = arith.constant 2 : index
    %c0_92 = arith.constant 0 : index
    %398 = vector.load %arg12[%c0_90, %c2_91, %c0_92] : memref<2x8x32xf32, #tpu.memory_space<vmem>>, vector<2x1x32xf32>
    %399 = vector.shape_cast %398 : vector<2x1x32xf32> to vector<2x32xf32>
    %400 = vector.shape_cast %394 : vector<2x32xf32> to vector<2x1x32xf32>
    tpu.vector_store %arg12[%c0_90, %c2_91, %c0_92], %400 {strides = array<i32>} : memref<2x8x32xf32, #tpu.memory_space<vmem>>, vector<2x1x32xf32>,
    %401 = vector.extract_strided_slice %7 {offsets = [0, 6, 0], sizes = [2, 1, 128], strides = [1, 1, 1]} : vector<2x8x128xf32> to vector<2x1x128xf32>
    %402 = vector.shape_cast %401 : vector<2x1x128xf32> to vector<2x128xf32>
    %cst_93 = arith.constant dense<0.000000e+00> : vector<2x128xf32>
    %403 = tpu.matmul %365, %14, %cst_93 {dimension_numbers = #tpu.dot_dimension_numbers<[1], [0], [0], [1], [0, 0, 1, 1], [], []>} : vector<2x32xf32>, vector<32x128xf32>, vector<2x128xf32> -> vector<2x128xf32>
    %404 = arith.addf %402, %403 : vector<2x128xf32>
    %405 = vector.extract_strided_slice %404 {offsets = [0, 0], sizes = [2, 32], strides = [1, 1]} : vector<2x128xf32> to vector<2x32xf32>
    %406 = arith.negf %405 : vector<2x32xf32>
    %407 = math.exp %406 : vector<2x32xf32>
    %cst_94 = arith.constant 1.000000e+00 : f32
    %408 = vector.broadcast %cst_94 : f32 to vector<2x32xf32>
    %409 = arith.addf %408, %407 : vector<2x32xf32>
    %410 = arith.divf %408, %409 : vector<2x32xf32>
    %411 = vector.extract_strided_slice %404 {offsets = [0, 32], sizes = [2, 32], strides = [1, 1]} : vector<2x128xf32> to vector<2x32xf32>
    %412 = arith.negf %411 : vector<2x32xf32>
    %413 = math.exp %412 : vector<2x32xf32>
    %cst_95 = arith.constant 1.000000e+00 : f32
    %414 = vector.broadcast %cst_95 : f32 to vector<2x32xf32>
    %415 = arith.addf %414, %413 : vector<2x32xf32>
    %416 = arith.divf %414, %415 : vector<2x32xf32>
    %417 = vector.extract_strided_slice %404 {offsets = [0, 64], sizes = [2, 32], strides = [1, 1]} : vector<2x128xf32> to vector<2x32xf32>
    %418 = math.tanh %417 : vector<2x32xf32>
    %419 = vector.extract_strided_slice %404 {offsets = [0, 96], sizes = [2, 32], strides = [1, 1]} : vector<2x128xf32> to vector<2x32xf32>
    %420 = arith.negf %419 : vector<2x32xf32>
    %421 = math.exp %420 : vector<2x32xf32>
    %cst_96 = arith.constant 1.000000e+00 : f32
    %422 = vector.broadcast %cst_96 : f32 to vector<2x32xf32>
    %423 = arith.addf %422, %421 : vector<2x32xf32>
    %424 = arith.divf %422, %423 : vector<2x32xf32>
    %425 = arith.mulf %416, %363 : vector<2x32xf32>
    %426 = arith.mulf %410, %418 : vector<2x32xf32>
    %427 = arith.addf %425, %426 : vector<2x32xf32>
    %428 = math.tanh %427 : vector<2x32xf32>
    %429 = arith.mulf %424, %428 : vector<2x32xf32>
    %430 = vector.extract_strided_slice %13 {offsets = [0, 1, 0], sizes = [2, 1, 128], strides = [1, 1, 1]} : vector<2x8x128xf32> to vector<2x1x128xf32>
    %431 = vector.shape_cast %430 : vector<2x1x128xf32> to vector<2x128xf32>
    %cst_97 = arith.constant dense<0.000000e+00> : vector<2x128xf32>
    %432 = tpu.matmul %394, %15, %cst_97 {dimension_numbers = #tpu.dot_dimension_numbers<[1], [0], [0], [1], [0, 0, 1, 1], [], []>} : vector<2x32xf32>, vector<32x128xf32>, vector<2x128xf32> -> vector<2x128xf32>
    %433 = arith.addf %431, %432 : vector<2x128xf32>
    %434 = vector.extract_strided_slice %433 {offsets = [0, 0], sizes = [2, 32], strides = [1, 1]} : vector<2x128xf32> to vector<2x32xf32>
    %435 = arith.negf %434 : vector<2x32xf32>
    %436 = math.exp %435 : vector<2x32xf32>
    %cst_98 = arith.constant 1.000000e+00 : f32
    %437 = vector.broadcast %cst_98 : f32 to vector<2x32xf32>
    %438 = arith.addf %437, %436 : vector<2x32xf32>
    %439 = arith.divf %437, %438 : vector<2x32xf32>
    %440 = vector.extract_strided_slice %433 {offsets = [0, 32], sizes = [2, 32], strides = [1, 1]} : vector<2x128xf32> to vector<2x32xf32>
    %441 = arith.negf %440 : vector<2x32xf32>
    %442 = math.exp %441 : vector<2x32xf32>
    %cst_99 = arith.constant 1.000000e+00 : f32
    %443 = vector.broadcast %cst_99 : f32 to vector<2x32xf32>
    %444 = arith.addf %443, %442 : vector<2x32xf32>
    %445 = arith.divf %443, %444 : vector<2x32xf32>
    %446 = vector.extract_strided_slice %433 {offsets = [0, 64], sizes = [2, 32], strides = [1, 1]} : vector<2x128xf32> to vector<2x32xf32>
    %447 = math.tanh %446 : vector<2x32xf32>
    %448 = vector.extract_strided_slice %433 {offsets = [0, 96], sizes = [2, 32], strides = [1, 1]} : vector<2x128xf32> to vector<2x32xf32>
    %449 = arith.negf %448 : vector<2x32xf32>
    %450 = math.exp %449 : vector<2x32xf32>
    %cst_100 = arith.constant 1.000000e+00 : f32
    %451 = vector.broadcast %cst_100 : f32 to vector<2x32xf32>
    %452 = arith.addf %451, %450 : vector<2x32xf32>
    %453 = arith.divf %451, %452 : vector<2x32xf32>
    %454 = arith.mulf %445, %392 : vector<2x32xf32>
    %455 = arith.mulf %439, %447 : vector<2x32xf32>
    %456 = arith.addf %454, %455 : vector<2x32xf32>
    %457 = math.tanh %456 : vector<2x32xf32>
    %458 = arith.mulf %453, %457 : vector<2x32xf32>
    %c0_101 = arith.constant 0 : index
    %c6_102 = arith.constant 6 : index
    %c0_103 = arith.constant 0 : index
    %459 = vector.load %arg11[%c0_101, %c6_102, %c0_103] : memref<2x8x32xf32, #tpu.memory_space<vmem>>, vector<2x1x32xf32>
    %460 = vector.shape_cast %459 : vector<2x1x32xf32> to vector<2x32xf32>
    %461 = vector.shape_cast %429 : vector<2x32xf32> to vector<2x1x32xf32>
    tpu.vector_store %arg11[%c0_101, %c6_102, %c0_103], %461 {strides = array<i32>} : memref<2x8x32xf32, #tpu.memory_space<vmem>>, vector<2x1x32xf32>,
    %c0_104 = arith.constant 0 : index
    %c1_105 = arith.constant 1 : index
    %c0_106 = arith.constant 0 : index
    %462 = vector.load %arg12[%c0_104, %c1_105, %c0_106] : memref<2x8x32xf32, #tpu.memory_space<vmem>>, vector<2x1x32xf32>
    %463 = vector.shape_cast %462 : vector<2x1x32xf32> to vector<2x32xf32>
    %464 = vector.shape_cast %458 : vector<2x32xf32> to vector<2x1x32xf32>
    tpu.vector_store %arg12[%c0_104, %c1_105, %c0_106], %464 {strides = array<i32>} : memref<2x8x32xf32, #tpu.memory_space<vmem>>, vector<2x1x32xf32>,
    %465 = vector.extract_strided_slice %7 {offsets = [0, 7, 0], sizes = [2, 1, 128], strides = [1, 1, 1]} : vector<2x8x128xf32> to vector<2x1x128xf32>
    %466 = vector.shape_cast %465 : vector<2x1x128xf32> to vector<2x128xf32>
    %cst_107 = arith.constant dense<0.000000e+00> : vector<2x128xf32>
    %467 = tpu.matmul %429, %14, %cst_107 {dimension_numbers = #tpu.dot_dimension_numbers<[1], [0], [0], [1], [0, 0, 1, 1], [], []>} : vector<2x32xf32>, vector<32x128xf32>, vector<2x128xf32> -> vector<2x128xf32>
    %468 = arith.addf %466, %467 : vector<2x128xf32>
    %469 = vector.extract_strided_slice %468 {offsets = [0, 0], sizes = [2, 32], strides = [1, 1]} : vector<2x128xf32> to vector<2x32xf32>
    %470 = arith.negf %469 : vector<2x32xf32>
    %471 = math.exp %470 : vector<2x32xf32>
    %cst_108 = arith.constant 1.000000e+00 : f32
    %472 = vector.broadcast %cst_108 : f32 to vector<2x32xf32>
    %473 = arith.addf %472, %471 : vector<2x32xf32>
    %474 = arith.divf %472, %473 : vector<2x32xf32>
    %475 = vector.extract_strided_slice %468 {offsets = [0, 32], sizes = [2, 32], strides = [1, 1]} : vector<2x128xf32> to vector<2x32xf32>
    %476 = arith.negf %475 : vector<2x32xf32>
    %477 = math.exp %476 : vector<2x32xf32>
    %cst_109 = arith.constant 1.000000e+00 : f32
    %478 = vector.broadcast %cst_109 : f32 to vector<2x32xf32>
    %479 = arith.addf %478, %477 : vector<2x32xf32>
    %480 = arith.divf %478, %479 : vector<2x32xf32>
    %481 = vector.extract_strided_slice %468 {offsets = [0, 64], sizes = [2, 32], strides = [1, 1]} : vector<2x128xf32> to vector<2x32xf32>
    %482 = math.tanh %481 : vector<2x32xf32>
    %483 = vector.extract_strided_slice %468 {offsets = [0, 96], sizes = [2, 32], strides = [1, 1]} : vector<2x128xf32> to vector<2x32xf32>
    %484 = arith.negf %483 : vector<2x32xf32>
    %485 = math.exp %484 : vector<2x32xf32>
    %cst_110 = arith.constant 1.000000e+00 : f32
    %486 = vector.broadcast %cst_110 : f32 to vector<2x32xf32>
    %487 = arith.addf %486, %485 : vector<2x32xf32>
    %488 = arith.divf %486, %487 : vector<2x32xf32>
    %489 = arith.mulf %480, %427 : vector<2x32xf32>
    %490 = arith.mulf %474, %482 : vector<2x32xf32>
    %491 = arith.addf %489, %490 : vector<2x32xf32>
    %492 = math.tanh %491 : vector<2x32xf32>
    %493 = arith.mulf %488, %492 : vector<2x32xf32>
    %494 = vector.extract_strided_slice %13 {offsets = [0, 0, 0], sizes = [2, 1, 128], strides = [1, 1, 1]} : vector<2x8x128xf32> to vector<2x1x128xf32>
    %495 = vector.shape_cast %494 : vector<2x1x128xf32> to vector<2x128xf32>
    %cst_111 = arith.constant dense<0.000000e+00> : vector<2x128xf32>
    %496 = tpu.matmul %458, %15, %cst_111 {dimension_numbers = #tpu.dot_dimension_numbers<[1], [0], [0], [1], [0, 0, 1, 1], [], []>} : vector<2x32xf32>, vector<32x128xf32>, vector<2x128xf32> -> vector<2x128xf32>
    %497 = arith.addf %495, %496 : vector<2x128xf32>
    %498 = vector.extract_strided_slice %497 {offsets = [0, 0], sizes = [2, 32], strides = [1, 1]} : vector<2x128xf32> to vector<2x32xf32>
    %499 = arith.negf %498 : vector<2x32xf32>
    %500 = math.exp %499 : vector<2x32xf32>
    %cst_112 = arith.constant 1.000000e+00 : f32
    %501 = vector.broadcast %cst_112 : f32 to vector<2x32xf32>
    %502 = arith.addf %501, %500 : vector<2x32xf32>
    %503 = arith.divf %501, %502 : vector<2x32xf32>
    %504 = vector.extract_strided_slice %497 {offsets = [0, 32], sizes = [2, 32], strides = [1, 1]} : vector<2x128xf32> to vector<2x32xf32>
    %505 = arith.negf %504 : vector<2x32xf32>
    %506 = math.exp %505 : vector<2x32xf32>
    %cst_113 = arith.constant 1.000000e+00 : f32
    %507 = vector.broadcast %cst_113 : f32 to vector<2x32xf32>
    %508 = arith.addf %507, %506 : vector<2x32xf32>
    %509 = arith.divf %507, %508 : vector<2x32xf32>
    %510 = vector.extract_strided_slice %497 {offsets = [0, 64], sizes = [2, 32], strides = [1, 1]} : vector<2x128xf32> to vector<2x32xf32>
    %511 = math.tanh %510 : vector<2x32xf32>
    %512 = vector.extract_strided_slice %497 {offsets = [0, 96], sizes = [2, 32], strides = [1, 1]} : vector<2x128xf32> to vector<2x32xf32>
    %513 = arith.negf %512 : vector<2x32xf32>
    %514 = math.exp %513 : vector<2x32xf32>
    %cst_114 = arith.constant 1.000000e+00 : f32
    %515 = vector.broadcast %cst_114 : f32 to vector<2x32xf32>
    %516 = arith.addf %515, %514 : vector<2x32xf32>
    %517 = arith.divf %515, %516 : vector<2x32xf32>
    %518 = arith.mulf %509, %456 : vector<2x32xf32>
    %519 = arith.mulf %503, %511 : vector<2x32xf32>
    %520 = arith.addf %518, %519 : vector<2x32xf32>
    %521 = math.tanh %520 : vector<2x32xf32>
    %522 = arith.mulf %517, %521 : vector<2x32xf32>
    %c0_115 = arith.constant 0 : index
    %c7_116 = arith.constant 7 : index
    %c0_117 = arith.constant 0 : index
    %523 = vector.load %arg11[%c0_115, %c7_116, %c0_117] : memref<2x8x32xf32, #tpu.memory_space<vmem>>, vector<2x1x32xf32>
    %524 = vector.shape_cast %523 : vector<2x1x32xf32> to vector<2x32xf32>
    %525 = vector.shape_cast %493 : vector<2x32xf32> to vector<2x1x32xf32>
    tpu.vector_store %arg11[%c0_115, %c7_116, %c0_117], %525 {strides = array<i32>} : memref<2x8x32xf32, #tpu.memory_space<vmem>>, vector<2x1x32xf32>,
    %c0_118 = arith.constant 0 : index
    %c0_119 = arith.constant 0 : index
    %c0_120 = arith.constant 0 : index
    %526 = vector.load %arg12[%c0_118, %c0_119, %c0_120] : memref<2x8x32xf32, #tpu.memory_space<vmem>>, vector<2x1x32xf32>
    %527 = vector.shape_cast %526 : vector<2x1x32xf32> to vector<2x32xf32>
    %528 = vector.shape_cast %522 : vector<2x32xf32> to vector<2x1x32xf32>
    tpu.vector_store %arg12[%c0_118, %c0_119, %c0_120], %528 {strides = array<i32>} : memref<2x8x32xf32, #tpu.memory_space<vmem>>, vector<2x1x32xf32>,
    %c0_121 = arith.constant 0 : index
    %c0_122 = arith.constant 0 : index
    %c0_123 = arith.constant 0 : index
    %529 = vector.load %arg11[%c0_121, %c0_122, %c0_123] : memref<2x8x32xf32, #tpu.memory_space<vmem>>, vector<2x8x32xf32>
    %530 = vector.shape_cast %529 : vector<2x8x32xf32> to vector<16x32xf32>
    %c0_124 = arith.constant 0 : index
    %c0_125 = arith.constant 0 : index
    %c0_126 = arith.constant 0 : index
    %531 = vector.load %arg12[%c0_124, %c0_125, %c0_126] : memref<2x8x32xf32, #tpu.memory_space<vmem>>, vector<2x8x32xf32>
    %532 = vector.shape_cast %531 : vector<2x8x32xf32> to vector<16x32xf32>
    %c0_127 = arith.constant 0 : index
    %c0_128 = arith.constant 0 : index
    %533 = vector.load %arg7[%c0_127, %c0_128] : memref<32x10xf32, #tpu.memory_space<vmem>>, vector<32x10xf32>
    %cst_129 = arith.constant dense<0.000000e+00> : vector<16x10xf32>
    %534 = tpu.matmul %530, %533, %cst_129 {dimension_numbers = #tpu.dot_dimension_numbers<[1], [0], [0], [1], [0, 0, 1, 1], [], []>} : vector<16x32xf32>, vector<32x10xf32>, vector<16x10xf32> -> vector<16x10xf32>
    %c0_130 = arith.constant 0 : index
    %c0_131 = arith.constant 0 : index
    %535 = vector.load %arg8[%c0_130, %c0_131] : memref<32x10xf32, #tpu.memory_space<vmem>>, vector<32x10xf32>
    %cst_132 = arith.constant dense<0.000000e+00> : vector<16x10xf32>
    %536 = tpu.matmul %532, %535, %cst_132 {dimension_numbers = #tpu.dot_dimension_numbers<[1], [0], [0], [1], [0, 0, 1, 1], [], []>} : vector<16x32xf32>, vector<32x10xf32>, vector<16x10xf32> -> vector<16x10xf32>
    %537 = arith.addf %534, %536 : vector<16x10xf32>
    %c0_133 = arith.constant 0 : index
    %c0_134 = arith.constant 0 : index
    %538 = vector.load %arg9[%c0_133, %c0_134] : memref<1x10xf32, #tpu.memory_space<vmem>>, vector<1x10xf32>
    %539 = vector.broadcast %538 : vector<1x10xf32> to vector<16x10xf32>
    %540 = arith.addf %537, %539 : vector<16x10xf32>
    %541 = vector.shape_cast %540 : vector<16x10xf32> to vector<2x8x10xf32>
    %c0_135 = arith.constant 0 : index
    %c0_136 = arith.constant 0 : index
    %c0_137 = arith.constant 0 : index
    %542 = vector.load %arg10[%c0_135, %c0_136, %c0_137] : memref<2x8x10xf32, #tpu.memory_space<vmem>>, vector<2x8x10xf32>
    tpu.vector_store %arg10[%c0_135, %c0_136, %c0_137], %541 {strides = array<i32>} : memref<2x8x10xf32, #tpu.memory_space<vmem>>, vector<2x8x10xf32>,
    return
  }
}

</mosaic_0001>

<bundles_post_ra>
// kernel: tpu_custom_call.1
= control target key start
LH: loop header
LB: loop body
LE: loop exit
PB: predicated region body
PF: predicated region fallthrough
CT: control target
= control target key end

     0   :  { %15 = vsyncpa [#allocation5], 0  ;;  %s4407_s0 = inlined_call_operand.vmem [shape: f32[2,8,16], index: 0, kind: input, shape index: {}]   ;;  %s4408_s1 = inlined_call_operand.hbm [shape: f32[16,128], index: 1, kind: input, shape index: {}]   ;;  %s4409_s2 = inlined_call_operand.vmem [shape: f32[32,128], index: 2, kind: input, shape index: {}]   ;;  %s4410_s3 = inlined_call_operand.vmem [shape: f32[1,128], index: 3, kind: input, shape index: {}]   ;;  %s4411_s4 = inlined_call_operand.hbm [shape: f32[16,128], index: 4, kind: input, shape index: {}]   ;;  %s4412_s5 = inlined_call_operand.vmem [shape: f32[32,128], index: 5, kind: input, shape index: {}]   ;;  %s4413_s6 = inlined_call_operand.vmem [shape: f32[1,128], index: 6, kind: input, shape index: {}]   ;;  %s4414_s7 = inlined_call_operand.vmem [shape: f32[32,10], index: 7, kind: input, shape index: {}]   ;;  %s4415_s8 = inlined_call_operand.vmem [shape: f32[32,10], index: 8, kind: input, shape index: {}]   ;;  %s4416_s9 = inlined_call_operand.vmem [shape: f32[1,10], index: 9, kind: input, shape index: {}]   ;;  %s4417_s10 = inlined_call_operand.hbm [shape: f32[2,8,10], index: 10, kind: output, shape index: {}]  }
   0x1   :  { %16 = vsyncpa [#allocation8], 0 }
   0x2   :  { %17 = vsyncpa [#allocation6], 0  ;;  %s3630_s13 = smov [#allocation4]   ;;  %s3558_s17 = scalar_lea.hbm %s4408_s1, 256 }
   0x3   :  { %s25_s14 = sshll.u32 %s3630_s13, 4  ;;  %p3559_p0 = scmp.ne.s32.totalorder %s4408_s1, %s3558_s17  ;;  %s26_s14 = int_to_ptr.vmem [resolvable:$true] %s25_s14 }
   0x4   :  { %p3562_p1 = scmp.lt.u32.totalorder %s3558_s17, %s4408_s1 }
   0x6   :  { %p3564_p2 = pnand %p3562_p1, %p3559_p0 }
   0x8   :  { %3567 = shalt.err (!%p3564_p2)
}
   0x9   :  { %s3568_s22 = scalar_lea.vmem %s26_s14, 256  ;;  %p3573_p4 = scmp.lt.s32.totalorder %s26_s14, %s26_s14 }
   0xa   :  { %p3569_p3 = scmp.ne.s32.totalorder %s26_s14, %s3568_s22  ;;  %p3574_p5 = scmp.lt.s32.totalorder %s3568_s22, %s3568_s22 }
   0xc   :  { %p3575_p6 = por %p3574_p5, %p3573_p4 }
   0xe   :  { %p3576_p7 = pnand %p3575_p6, %p3569_p3 }
  0x10   :  { %3579 = shalt.err (!%p3576_p7)
}
  0x11   :  { %s3631_s23 = smov 128   ;;  %s3632_s24 = smov 8  }
  0x12   :  { %31 = dma.hbm_to_vmem [thread:$0]  %s4408_s1, 256, %s26_s14, [#allocation5], %s3631_s23, %s3631_s23, %s3632_s24  }
  0x13   :  { %s3633_s27 = smov [#allocation7]   ;;  %s3580_s11 = scalar_lea.hbm %s4411_s4, 256 }
  0x14   :  { %s41_s28 = sshll.u32 %s3633_s27, 4  ;;  %p3581_p8 = scmp.ne.s32.totalorder %s4411_s4, %s3580_s11  ;;  %s42_s28 = int_to_ptr.vmem [resolvable:$true] %s41_s28 }
  0x15   :  { %p3584_p9 = scmp.lt.u32.totalorder %s3580_s11, %s4411_s4 }
  0x17   :  { %p3586_p10 = pnand %p3584_p9, %p3581_p8 }
  0x19   :  { %3589 = shalt.err (!%p3586_p10)
}
  0x1a   :  { %s3590_s17 = scalar_lea.vmem %s42_s28, 256  ;;  %p3595_p12 = scmp.lt.s32.totalorder %s42_s28, %s42_s28 }
  0x1b   :  { %p3591_p11 = scmp.ne.s32.totalorder %s42_s28, %s3590_s17  ;;  %p3596_p13 = scmp.lt.s32.totalorder %s3590_s17, %s3590_s17 }
  0x1d   :  { %p3597_p0 = por %p3596_p13, %p3595_p12 }
  0x1f   :  { %p3598_p1 = pnand %p3597_p0, %p3591_p11 }
  0x21   :  { %3601 = shalt.err (!%p3598_p1)
}
  0x22   :  { %47 = dma.hbm_to_vmem [thread:$0]  %s4411_s4, 256, %s42_s28, [#allocation8], %s3631_s23, %s3631_s23, %s3632_s24  }
  0x23   :  { %3624 = dma.done.wait [#allocation5], 256  }
  0x24   :  { %3625 = vsyncadd [#allocation5], 4294967040 }
  0x25   :  { %3626 = dma.done.wait [#allocation8], 256  }
  0x26   :  { %3627 = vsyncadd [#allocation8], 4294967040  ;;  %vm75_vm0 = vcmask 130048   ;;  %v157_v0 = vld [vmem:[#allocation7] sm:$0xff]  ;;  %v158_v1 = vld [vmem:[#allocation7 + $0x8] sm:$0xff]  ;;  %v3634_v11 = vmov 0.0|0.0  }
  0x27   :  { %v64_v2 = vld [vmem:[%s4407_s0] sm:$0xff]  ;;  %v3174_v3 = vpack.c.bf16 %v158_v1, %v157_v0  ;;  %v242_v5 = vld [vmem:[%s4409_s2 + $0x8] sm:$0xff]  ;;  %v243_v12 = vld [vmem:[%s4409_s2 + $0x10] sm:$0xff]  ;;  %vm3635_vm1 = vmmov 0   ;;  %v3636_v15 = vmov 0.0   ;;  %vm525_vm2 = vcmask 1041409  }
  0x28   :  { %2969 = vmatprep.mubr.msk.f32.mxu1 %vm75_vm0, %v64_v2  ;;  %v241_v4 = vld [vmem:[%s4409_s2] sm:$0xff]  ;;  %2962 = vmatprep.mubr.msk.f32.mxu0 %vm75_vm0, %v64_v2  ;;  %v67_v7 = vld [vmem:[#allocation4 + $0x8] sm:$0xff]  ;;  %v244_v13 = vld [vmem:[%s4409_s2 + $0x18] sm:$0xff]  ;;  %vm249_vm3 = vcmask 261120   ;;  %vm521_vm4 = vcmask 261127   ;;  %vm818_vm5 = vcmask 260102  }
  0x29   :  { %v66_v6 = vld [vmem:[#allocation4] sm:$0xff]  ;;  %3175 = vmatprep.subr.bf16.mxu1 %v3174_v3  ;;  %v65_v9 = vld [vmem:[%s4407_s0 + $0x8] sm:$0xff]  ;;  %v3739_v10 = vpack.c.bf16 %v242_v5, %v241_v4  ;;  %v3751_v14 = vpack.c.bf16 %v244_v13, %v243_v12  ;;  %v247_v19 = vld [vmem:[%s4412_s5 + $0x10] sm:$0xff]  ;;  %vm1115_vm6 = vcmask 259077   ;;  %vm1413_vm7 = vcmask 258052   ;;  %s3639_s15 = smov [#allocation9]  }
  0x2a   :  { %v3170_v8 = vpack.c.bf16 %v67_v7, %v66_v6  ;;  %3177 = vmatpush3.bf16.msra.mxu1 %v3174_v3  ;;  %v245_v16 = vld [vmem:[%s4412_s5] sm:$0xff]  ;;  %v246_v17 = vld [vmem:[%s4412_s5 + $0x8] sm:$0xff]  ;;  %v248_v20 = vld [vmem:[%s4412_s5 + $0x18] sm:$0xff]  ;;  %vm1402_vm8 = vcmask 257027   ;;  %vm1104_vm9 = vcmask 256002   ;;  %vm807_vm10 = vcmask 254977  }
  0x2b   :  { %3178 = vmatprep.subr.bf16.mxu1 %v3634_v11  ;;  %v3768_v18 = vpack.c.bf16 %v246_v17, %v245_v16  ;;  %v3781_v21 = vpack.c.bf16 %v248_v20, %v247_v19  ;;  %v2801_v26 = vld [vmem:[%s4410_s3] ss:$0 sm:$0xff]  ;;  %s3637_s3 = smov 64   ;;  %vm510_vm11 = vcmask 253952   ;;  %s2788_s16 = sshll.u32 %s3639_s15, 4  ;;  %vm2780_vm12 = vcmask 80896   ;;  %s2789_s16 = int_to_ptr.vmem [resolvable:$true] %s2788_s16 }
  0x2c   :  { %3171 = vmatprep.subr.bf16.mxu0 %v3170_v8  ;;  %v2804_v33 = vld [vmem:[%s4413_s6] ss:$0 sm:$0xff]  ;;  %s3638_s6 = smov 32   ;;  %s3602_s17 = scalar_lea.vmem %s2789_s16, 256 }
  0x2d   :  { %3173 = vmatpush3.bf16.msra.mxu0 %v3170_v8  ;;  %2970 = vmatmul.mubr.msk.f32.vlgmr.msra.gmra.mrb[0].mxu1 %vm75_vm0, %v65_v9  ;;  %p3603_p2 = scmp.ne.s32.totalorder %s2789_s16, %s3602_s17  ;;  %p3607_p3 = scmp.lt.s32.totalorder %s2789_s16, %s2789_s16 }
  0x2e   :  { %3190 = vmatprep.subr.bf16.mxu0 %v3634_v11  ;;  %3180 = vmatpush3.bf16.msra.mxu1 %v3739_v10  ;;  %p3608_p4 = scmp.lt.s32.totalorder %s3602_s17, %s3602_s17 }
  0x2f   :  { %2980 = vmatprep.mubr.msk.f32.mxu1 %vm3635_vm1, %v3636_v15  ;;  %3181 = vmatprep.subr.bf16.mxu1 %v3634_v11 }
  0x30   :  { %2963 = vmatmul.mubr.msk.f32.vlgmr.msra.gmra.mrb[0].mxu0 %vm75_vm0, %v65_v9  ;;  %p3609_p5 = por %p3608_p4, %p3607_p3 }
  0x31   :  { %3192 = vmatpush3.bf16.msra.mxu0 %v3739_v10  ;;  %3002 = vmatprep.mubr.msk.f32.mxu0 %vm3635_vm1, %v3636_v15 }
  0x32   :  { %3193 = vmatprep.subr.bf16.mxu0 %v3634_v11  ;;  %3183 = vmatpush3.bf16.msra.mxu1 %v3751_v14  ;;  %p3610_p6 = pnand %p3609_p5, %p3603_p2 }
  0x33   :  { %3184 = vmatprep.subr.bf16.mxu1 %v3634_v11 }
  0x35   :  { %3195 = vmatpush3.bf16.msra.mxu0 %v3751_v14  ;;  %2981 = vmatmul.mubr.f32.vlgmr.msra.gmra.mrb[2].mxu1 %v3636_v15 }
  0x36   :  { %3202 = vmatprep.subr.bf16.mxu0 %v3634_v11  ;;  %3186 = vmatpush3.bf16.msra.mxu1 %v3768_v18 }
  0x37   :  { %2991 = vmatprep.mubr.msk.f32.mxu1 %vm3635_vm1, %v3636_v15  ;;  %3187 = vmatprep.subr.bf16.mxu1 %v3634_v11 }
  0x3a   :  { %3189 = vmatpush3.bf16.msra.mxu1 %v3781_v21 }
  0x3b   :  { %3196 = vmatprep.subr.bf16.mxu1 %v3634_v11 }
  0x3d   :  { %2992 = vmatmul.mubr.f32.vlgmr.msra.gmra.mrb[4].mxu1 %v3636_v15 }
  0x3e   :  { %3198 = vmatpush3.bf16.msra.mxu1 %v3768_v18  ;;  %3013 = vmatprep.mubr.msk.f32.mxu1 %vm3635_vm1, %v3636_v15 }
  0x3f   :  { %3199 = vmatprep.subr.bf16.mxu1 %v3634_v11 }
  0x42   :  { %3201 = vmatpush3.bf16.msra.mxu1 %v3781_v21 }
  0x43   :  { %3208 = vmatprep.subr.bf16.mxu1 %v3634_v11 }
 0x100   :  { %v2971_v22 = vpop.f32.mrb[0].mxu1 }
 0x101   :  { %v232_v23 = vpop.f32.mrb[1].mxu1  ;;  %v3809_v40 = vadd.f32 %v2971_v22, %v2804_v33 }
 0x102   :  { %v3807_v36 = vadd.f32 %v2804_v33, %v232_v23 }
 0x103   :  { %v2964_v24 = vpop.f32.mrb[0].mxu0 }
 0x104   :  { %v148_v25 = vpop.f32.mrb[1].mxu0  ;;  %v3798_v27 = vadd.f32 %v2964_v24, %v2801_v26 }
 0x105   :  { %v3800_v31 = vadd.f32 %v2801_v26, %v148_v25 }
 0x108   :  { %v319_v28 = vpop.f32.mrb[2].mxu1 }
 0x109   :  { %v324_v29 = vrot.slane %v319_v28, 1  ;;  %v2982_v30 = vpop.f32.mrb[3].mxu1  ;;  %v327_v34 = vadd.f32 %v319_v28, %v3800_v31 }
 0x10b   :  { %v328_v32 = vadd.f32 %v324_v29, %v3798_v27  ;;  %v2807_v50 = vmul.f32 -1.442695, %v327_v34 }
 0x10d   :  { %3302 = vtanh.f32 %v328_v32  ;;  %v2808_v48 = vmul.f32 -1.442695, %v328_v32 }
 0x10e   :  { %3304 = vtanh.f32 %v327_v34 }
 0x110   :  { %v443_v35 = vpop.f32.mrb[4].mxu1 }
 0x111   :  { %v448_v37 = vrot.slane %v443_v35, 1  ;;  %v449_v38 = vrot.slane %v443_v35, 2  ;;  %v2993_v39 = vpop.f32.mrb[5].mxu1 }
 0x113   :  { %v452_v41 = vadd.f32 %v448_v37, %v3807_v36  ;;  %v453_v42 = vadd.f32 %v449_v38, %v3809_v40 }
 0x115   :  { %3306 = vtanh.f32 %v452_v41  ;;  %v2809_v47 = vmul.f32 -1.442695, %v452_v41  ;;  %v2810_v49 = vmul.f32 -1.442695, %v453_v42 }
 0x116   :  { %3308 = vtanh.f32 %v453_v42 }
 0x117   :  { %v3303_v43 = vpop.eup %3302  ;;  %3310 = vpow2.f32 %v2809_v47 }
 0x118   :  { %349 = vrot.lane.b32.xlu1 %v3303_v43, %s3637_s3  ;;  %v3305_v44 = vpop.eup %3304  ;;  %3312 = vpow2.f32 %v2808_v48 }
 0x119   :  { %3314 = vpow2.f32 %v2810_v49 }
 0x11a   :  { %3316 = vpow2.f32 %v2807_v50 }
 0x11c   :  { %347 = vrot.lane.b32.xlu1 %v3305_v44, %s3637_s3 }
 0x11f   :  { %v3307_v45 = vpop.eup %3306 }
 0x120   :  { %472 = vrot.lane.b32.xlu0 %v3307_v45, %s3637_s3  ;;  %v3309_v46 = vpop.eup %3308 }
 0x121   :  { %v3311_v51 = vpop.eup %3310 }
 0x122   :  { %v3313_v52 = vpop.eup %3312  ;;  %v460_v53 = vadd.f32 1.0, %v3311_v51 }
 0x123   :  { %v3315_v54 = vpop.eup %3314  ;;  %v336_v55 = vadd.f32 1.0, %v3313_v52 }
 0x124   :  { %474 = vrot.lane.b32.xlu0 %v3309_v46, %s3637_s3  ;;  %v461_v56 = vadd.f32 1.0, %v3315_v54  ;;  %3318 = vrcp.f32 %v460_v53  ;;  %v3317_v57 = vpop.eup %3316 }
 0x125   :  { %3320 = vrcp.f32 %v336_v55  ;;  %v335_v58 = vadd.f32 1.0, %v3317_v57 }
 0x126   :  { %3322 = vrcp.f32 %v461_v56 }
 0x127   :  { %3324 = vrcp.f32 %v335_v58 }
 0x12e   :  { %v3319_v59 = vpop.eup %3318 }
 0x12f   :  { %v3321_v63 = vpop.eup %3320  ;;  %v468_v7 = vmul.f32 0.0, %v3319_v59 }
 0x130   :  { %v3323_v0 = vpop.eup %3322  ;;  %v344_v12 = vmul.f32 0.0, %v3321_v63 }
 0x131   :  { %v3325_v5 = vpop.eup %3324  ;;  %v469_v13 = vmul.f32 0.0, %v3323_v0 }
 0x132   :  { %v343_v22 = vmul.f32 0.0, %v3325_v5 }
 0x18a   :  { %v350_v60 = vpop.permute.xlu1 %349 }
 0x18b   :  { %v354_v2 = vmul.f32 %v3321_v63, %v350_v60 }
 0x18e   :  { %v348_v4 = vpop.permute.xlu1 %347 }
 0x18f   :  { %v353_v6 = vmul.f32 %v3325_v5, %v348_v4 }
 0x192   :  { %v473_v61 = vpop.permute.xlu0 %472 }
 0x193   :  { %v478_v62 = vmul.f32 %v3319_v59, %v473_v61 }
 0x195   :  { %482 = vrot.lane.b32.xlu0 %v478_v62, %s3638_s6 }
 0x196   :  { %v475_v1 = vpop.permute.xlu0 %474 }
 0x197   :  { %v479_v3 = vmul.f32 %v3323_v0, %v475_v1 }
 0x199   :  { %359 = vrot.lane.b32.xlu0 %v354_v2, %s3638_s6  ;;  %484 = vrot.lane.b32.xlu1 %v479_v3, %s3638_s6 }
 0x19d   :  { %357 = vrot.lane.b32.xlu1 %v353_v6, %s3638_s6 }
 0x207   :  { %v483_v8 = vpop.permute.xlu0 %482 }
 0x208   :  { %v3821_v9 = vadd.f32 %v483_v8, %v468_v7 }
 0x20a   :  { %3326 = vtanh.f32 %v3821_v9 }
 0x20b   :  { %v360_v16 = vpop.permute.xlu0 %359  ;;  %v485_v17 = vpop.permute.xlu1 %484 }
 0x20c   :  { %v3824_v19 = vadd.f32 %v360_v16, %v344_v12  ;;  %v3826_v20 = vadd.f32 %v485_v17, %v469_v13 }
 0x20e   :  { %3328 = vtanh.f32 %v3824_v19 }
 0x20f   :  { %3330 = vtanh.f32 %v3826_v20  ;;  %v358_v23 = vpop.permute.xlu1 %357 }
 0x210   :  { %v3830_v24 = vadd.f32 %v358_v23, %v343_v22 }
 0x212   :  { %3332 = vtanh.f32 %v3830_v24 }
 0x214   :  { %v3327_v25 = vpop.eup %3326 }
 0x215   :  { %494 = vrot.lane.b32.xlu0 %v3327_v25, %s3637_s3 }
 0x218   :  { %v3329_v26 = vpop.eup %3328 }
 0x219   :  { %v3331_v28 = vpop.eup %3330  ;;  %371 = vrot.lane.b32.xlu0 %v3329_v26, %s3637_s3 }
 0x21a   :  { %496 = vrot.lane.b32.xlu1 %v3331_v28, %s3637_s3 }
 0x21c   :  { %v3333_v29 = vpop.eup %3332 }
 0x21e   :  { %369 = vrot.lane.b32.xlu1 %v3333_v29, %s3637_s3 }
 0x287   :  { %v495_v30 = vpop.permute.xlu0 %494 }
 0x288   :  { %v3837_v32 = vmul.f32 %v3319_v59, %v495_v30 }
 0x28a   :  { %v661_v38 = vrot.slane %v3837_v32, 7 }
 0x28b   :  { %v372_v33 = vpop.permute.xlu0 %371 }
 0x28c   :  { %v497_v34 = vpop.permute.xlu1 %496  ;;  %v3839_v35 = vmul.f32 %v3321_v63, %v372_v33 }
 0x28d   :  { %v3841_v37 = vmul.f32 %v3323_v0, %v497_v34 }
 0x28e   :  { %v524_v42 = vrot.slane %v3839_v35, 7 }
 0x28f   :  { %v662_v39 = vrot.slane %v3841_v37, 6 }
 0x290   :  { %v370_v41 = vpop.permute.xlu1 %369 }
 0x291   :  { %v3846_v43 = vmul.f32 %v3325_v5, %v370_v41  ;;  %v663_v44 = vsel %vm525_vm2, %v662_v39, %v661_v38  ;;  %v761_v39 = vrot.slane %v3821_v9, 1  ;;  %v762_v41 = vrot.slane %v3826_v20, 1 }
 0x292   :  { %664 = vrot.lane.b32.xlu0 %v663_v44, %s3638_s6 }
 0x293   :  { %v526_v45 = vsel %vm525_vm2, %v524_v42, %v3846_v43 }
 0x294   :  { %527 = vrot.lane.b32.xlu1 %v526_v45, %s3638_s6 }
 0x304   :  { %v665_v46 = vpop.permute.xlu0 %664 }
 0x305   :  { %3014 = vmatmul.mubr.msk.f32.vlgmr.msra.gmra.mrb[6].mxu1 %vm249_vm3, %v665_v46 }
 0x306   :  { %v528_v47 = vpop.permute.xlu1 %527  ;;  %3210 = vmatpush3.bf16.msra.mxu1 %v3768_v18  ;;  %3035 = vmatprep.mubr.msk.f32.mxu1 %vm3635_vm1, %v3636_v15 }
 0x307   :  { %3003 = vmatmul.mubr.msk.f32.vlgmr.msra.gmra.mrb[2].mxu0 %vm249_vm3, %v528_v47  ;;  %3211 = vmatprep.subr.bf16.mxu1 %v3634_v11 }
 0x308   :  { %3204 = vmatpush3.bf16.msra.mxu0 %v3739_v10  ;;  %3024 = vmatprep.mubr.msk.f32.mxu0 %vm3635_vm1, %v3636_v15 }
 0x309   :  { %3205 = vmatprep.subr.bf16.mxu0 %v3634_v11 }
 0x30a   :  { %3213 = vmatpush3.bf16.msra.mxu1 %v3781_v21 }
 0x30b   :  { %3220 = vmatprep.subr.bf16.mxu1 %v3634_v11 }
 0x30c   :  { %3207 = vmatpush3.bf16.msra.mxu0 %v3751_v14 }
 0x30d   :  { %3214 = vmatprep.subr.bf16.mxu0 %v3634_v11 }
 0x3d8   :  { %v734_v48 = vpop.f32.mrb[6].mxu1 }
 0x3d9   :  { %v739_v49 = vrot.slane %v734_v48, 2  ;;  %v740_v50 = vrot.slane %v734_v48, 3  ;;  %v3015_v51 = vpop.f32.mrb[7].mxu1 }
 0x3da   :  { %v597_v52 = vpop.f32.mrb[2].mxu0 }
 0x3db   :  { %v743_v53 = vadd.f32 %v739_v49, %v3807_v36  ;;  %v744_v54 = vadd.f32 %v740_v50, %v3809_v40  ;;  %v602_v55 = vrot.slane %v597_v52, 7  ;;  %v3004_v56 = vpop.f32.mrb[3].mxu0  ;;  %v606_v58 = vadd.f32 %v597_v52, %v3798_v27 }
 0x3dc   :  { %v623_v49 = vrot.slane %v3830_v24, 7  ;;  %v624_v50 = vrot.slane %v3824_v19, 7 }
 0x3dd   :  { %3334 = vtanh.f32 %v743_v53  ;;  %v605_v57 = vadd.f32 %v602_v55, %v3800_v31  ;;  %v2815_v63 = vmul.f32 -1.442695, %v743_v53  ;;  %v2816_v0 = vmul.f32 -1.442695, %v744_v54 }
 0x3de   :  { %3336 = vtanh.f32 %v744_v54  ;;  %v2813_v2 = vmul.f32 -1.442695, %v606_v58 }
 0x3df   :  { %3338 = vtanh.f32 %v605_v57  ;;  %v2812_v1 = vmul.f32 -1.442695, %v605_v57 }
 0x3e0   :  { %3340 = vtanh.f32 %v606_v58 }
 0x3e1   :  { %3342 = vpow2.f32 %v2815_v63 }
 0x3e2   :  { %3344 = vpow2.f32 %v2816_v0 }
 0x3e3   :  { %3346 = vpow2.f32 %v2812_v1 }
 0x3e4   :  { %3348 = vpow2.f32 %v2813_v2 }
 0x3e7   :  { %v3335_v59 = vpop.eup %3334 }
 0x3e8   :  { %v3337_v60 = vpop.eup %3336  ;;  %769 = vrot.lane.b32.xlu0 %v3335_v59, %s3637_s3 }
 0x3e9   :  { %771 = vrot.lane.b32.xlu1 %v3337_v60, %s3637_s3  ;;  %v3339_v61 = vpop.eup %3338 }
 0x3ea   :  { %v3341_v62 = vpop.eup %3340 }
 0x3eb   :  { %v3343_v3 = vpop.eup %3342 }
 0x3ec   :  { %631 = vrot.lane.b32.xlu0 %v3339_v61, %s3637_s3  ;;  %v3345_v4 = vpop.eup %3344  ;;  %v751_v5 = vadd.f32 1.0, %v3343_v3 }
 0x3ed   :  { %633 = vrot.lane.b32.xlu1 %v3341_v62, %s3637_s3  ;;  %v752_v6 = vadd.f32 1.0, %v3345_v4  ;;  %v3347_v7 = vpop.eup %3346 }
 0x3ee   :  { %v3349_v8 = vpop.eup %3348  ;;  %3350 = vrcp.f32 %v751_v5  ;;  %v613_v12 = vadd.f32 1.0, %v3347_v7 }
 0x3ef   :  { %3352 = vrcp.f32 %v752_v6  ;;  %v614_v13 = vadd.f32 1.0, %v3349_v8 }
 0x3f0   :  { %3354 = vrcp.f32 %v613_v12 }
 0x3f1   :  { %3356 = vrcp.f32 %v614_v13 }
 0x3f8   :  { %v3351_v16 = vpop.eup %3350 }
 0x3f9   :  { %v3353_v22 = vpop.eup %3352  ;;  %v765_v42 = vmul.f32 %v3351_v16, %v761_v39 }
 0x3fa   :  { %v3355_v28 = vpop.eup %3354  ;;  %v766_v45 = vmul.f32 %v3353_v22, %v762_v41 }
 0x3fb   :  { %v3357_v30 = vpop.eup %3356  ;;  %v627_v51 = vmul.f32 %v3355_v28, %v623_v49 }
 0x3fc   :  { %v628_v52 = vmul.f32 %v3357_v30, %v624_v50 }
 0x45a   :  { %v770_v17 = vpop.permute.xlu0 %769 }
 0x45b   :  { %v775_v23 = vmul.f32 %v3351_v16, %v770_v17  ;;  %v772_v25 = vpop.permute.xlu1 %771 }
 0x45c   :  { %v776_v26 = vmul.f32 %v3353_v22, %v772_v25 }
 0x45d   :  { %779 = vrot.lane.b32.xlu0 %v775_v23, %s3638_s6 }
 0x45e   :  { %781 = vrot.lane.b32.xlu1 %v776_v26, %s3638_s6  ;;  %v632_v29 = vpop.permute.xlu0 %631 }
 0x45f   :  { %v637_v33 = vmul.f32 %v3355_v28, %v632_v29  ;;  %v634_v34 = vpop.permute.xlu1 %633 }
 0x460   :  { %v638_v38 = vmul.f32 %v3357_v30, %v634_v34 }
 0x461   :  { %641 = vrot.lane.b32.xlu0 %v637_v33, %s3638_s6 }
 0x462   :  { %643 = vrot.lane.b32.xlu1 %v638_v38, %s3638_s6 }
 0x4cf   :  { %v780_v44 = vpop.permute.xlu0 %779 }
 0x4d0   :  { %v3881_v46 = vadd.f32 %v780_v44, %v765_v42  ;;  %v782_v47 = vpop.permute.xlu1 %781 }
 0x4d1   :  { %v3883_v48 = vadd.f32 %v782_v47, %v766_v45 }
 0x4d2   :  { %3358 = vtanh.f32 %v3881_v46 }
 0x4d3   :  { %3360 = vtanh.f32 %v3883_v48  ;;  %v642_v9 = vpop.permute.xlu0 %641 }
 0x4d4   :  { %v3889_v20 = vadd.f32 %v642_v9, %v627_v51  ;;  %v644_v53 = vpop.permute.xlu1 %643 }
 0x4d5   :  { %v3891_v54 = vadd.f32 %v644_v53, %v628_v52 }
 0x4d6   :  { %3362 = vtanh.f32 %v3889_v20 }
 0x4d7   :  { %3364 = vtanh.f32 %v3891_v54 }
 0x4dc   :  { %v3359_v55 = vpop.eup %3358 }
 0x4dd   :  { %v3361_v24 = vpop.eup %3360  ;;  %791 = vrot.lane.b32.xlu0 %v3359_v55, %s3637_s3 }
 0x4de   :  { %793 = vrot.lane.b32.xlu1 %v3361_v24, %s3637_s3 }
 0x4e0   :  { %v3363_v19 = vpop.eup %3362 }
 0x4e1   :  { %v3365_v56 = vpop.eup %3364  ;;  %653 = vrot.lane.b32.xlu0 %v3363_v19, %s3637_s3 }
 0x4e2   :  { %655 = vrot.lane.b32.xlu1 %v3365_v56, %s3637_s3 }
 0x54f   :  { %v792_v57 = vpop.permute.xlu0 %791 }
 0x550   :  { %v3899_v58 = vmul.f32 %v3351_v16, %v792_v57  ;;  %v794_v59 = vpop.permute.xlu1 %793 }
 0x551   :  { %v3901_v60 = vmul.f32 %v3353_v22, %v794_v59 }
 0x552   :  { %v958_v61 = vrot.slane %v3899_v58, 6 }
 0x553   :  { %v959_v62 = vrot.slane %v3901_v60, 5  ;;  %v654_v63 = vpop.permute.xlu0 %653 }
 0x554   :  { %v3906_v1 = vmul.f32 %v3355_v28, %v654_v63  ;;  %v656_v2 = vpop.permute.xlu1 %655 }
 0x555   :  { %v960_v0 = vsel %vm525_vm2, %v959_v62, %v958_v61  ;;  %v3910_v4 = vmul.f32 %v3357_v30, %v656_v2 }
 0x556   :  { %961 = vrot.lane.b32.xlu0 %v960_v0, %s3638_s6  ;;  %v821_v3 = vrot.slane %v3906_v1, 1 }
 0x558   :  { %v822_v5 = vsel %vm525_vm2, %v3910_v4, %v821_v3 }
 0x559   :  { %823 = vrot.lane.b32.xlu1 %v822_v5, %s3638_s6 }
 0x5c8   :  { %v962_v6 = vpop.permute.xlu0 %961 }
 0x5c9   :  { %3036 = vmatmul.mubr.msk.f32.vlgmr.msra.gmra.mrb[8].mxu1 %vm249_vm3, %v962_v6  ;;  %v1058_v6 = vrot.slane %v3881_v46, 1 }
 0x5ca   :  { %3222 = vmatpush3.bf16.msra.mxu1 %v3768_v18  ;;  %3057 = vmatprep.mubr.msk.f32.mxu1 %vm3635_vm1, %v3636_v15 }
 0x5cb   :  { %3223 = vmatprep.subr.bf16.mxu1 %v3634_v11  ;;  %v824_v7 = vpop.permute.xlu1 %823 }
 0x5cc   :  { %3025 = vmatmul.mubr.msk.f32.vlgmr.msra.gmra.mrb[4].mxu0 %vm249_vm3, %v824_v7  ;;  %v1059_v7 = vrot.slane %v3883_v48, 1 }
 0x5cd   :  { %3216 = vmatpush3.bf16.msra.mxu0 %v3739_v10  ;;  %3046 = vmatprep.mubr.msk.f32.mxu0 %vm3635_vm1, %v3636_v15 }
 0x5ce   :  { %3225 = vmatpush3.bf16.msra.mxu1 %v3781_v21  ;;  %3217 = vmatprep.subr.bf16.mxu0 %v3634_v11 }
 0x5cf   :  { %3232 = vmatprep.subr.bf16.mxu1 %v3634_v11 }
 0x5d1   :  { %3219 = vmatpush3.bf16.msra.mxu0 %v3751_v14 }
 0x5d2   :  { %3226 = vmatprep.subr.bf16.mxu0 %v3634_v11 }
 0x69c   :  { %v1031_v8 = vpop.f32.mrb[8].mxu1 }
 0x69d   :  { %v1036_v12 = vrot.slane %v1031_v8, 3  ;;  %v1037_v13 = vrot.slane %v1031_v8, 4  ;;  %v3037_v16 = vpop.f32.mrb[9].mxu1 }
 0x69f   :  { %v1040_v17 = vadd.f32 %v1036_v12, %v3807_v36  ;;  %v1041_v22 = vadd.f32 %v1037_v13, %v3809_v40  ;;  %v893_v23 = vpop.f32.mrb[4].mxu0 }
 0x6a0   :  { %v898_v25 = vrot.slane %v893_v23, 6  ;;  %v899_v26 = vrot.slane %v893_v23, 7  ;;  %v3026_v28 = vpop.f32.mrb[5].mxu0 }
 0x6a1   :  { %3366 = vtanh.f32 %v1040_v17  ;;  %v2821_v41 = vmul.f32 -1.442695, %v1040_v17  ;;  %v2822_v42 = vmul.f32 -1.442695, %v1041_v22 }
 0x6a2   :  { %3368 = vtanh.f32 %v1041_v22  ;;  %v902_v29 = vadd.f32 %v898_v25, %v3800_v31  ;;  %v903_v30 = vadd.f32 %v899_v26, %v3798_v27  ;;  %v920_v22 = vrot.slane %v3889_v20, 7 }
 0x6a3   :  { %v921_v25 = vrot.slane %v3891_v54, 7 }
 0x6a4   :  { %3370 = vtanh.f32 %v902_v29  ;;  %v2818_v44 = vmul.f32 -1.442695, %v902_v29  ;;  %v2819_v45 = vmul.f32 -1.442695, %v903_v30 }
 0x6a5   :  { %3372 = vtanh.f32 %v903_v30 }
 0x6a6   :  { %3374 = vpow2.f32 %v2821_v41 }
 0x6a7   :  { %3376 = vpow2.f32 %v2822_v42 }
 0x6a8   :  { %3378 = vpow2.f32 %v2818_v44 }
 0x6a9   :  { %3380 = vpow2.f32 %v2819_v45 }
 0x6ab   :  { %v3367_v33 = vpop.eup %3366 }
 0x6ac   :  { %v3369_v34 = vpop.eup %3368  ;;  %1066 = vrot.lane.b32.xlu0 %v3367_v33, %s3637_s3 }
 0x6ad   :  { %1068 = vrot.lane.b32.xlu1 %v3369_v34, %s3637_s3 }
 0x6ae   :  { %v3371_v38 = vpop.eup %3370 }
 0x6af   :  { %v3373_v39 = vpop.eup %3372 }
 0x6b0   :  { %928 = vrot.lane.b32.xlu0 %v3371_v38, %s3637_s3  ;;  %v3375_v47 = vpop.eup %3374 }
 0x6b1   :  { %930 = vrot.lane.b32.xlu1 %v3373_v39, %s3637_s3  ;;  %v3377_v49 = vpop.eup %3376  ;;  %v1048_v50 = vadd.f32 1.0, %v3375_v47 }
 0x6b2   :  { %v1049_v51 = vadd.f32 1.0, %v3377_v49  ;;  %v3379_v9 = vpop.eup %3378 }
 0x6b3   :  { %v3381_v52 = vpop.eup %3380  ;;  %3382 = vrcp.f32 %v1048_v50  ;;  %v910_v53 = vadd.f32 1.0, %v3379_v9 }
 0x6b4   :  { %3384 = vrcp.f32 %v1049_v51  ;;  %v911_v55 = vadd.f32 1.0, %v3381_v52 }
 0x6b5   :  { %3386 = vrcp.f32 %v910_v53 }
 0x6b6   :  { %3388 = vrcp.f32 %v911_v55 }
 0x6bd   :  { %v3383_v24 = vpop.eup %3382 }
 0x6be   :  { %v3385_v56 = vpop.eup %3384  ;;  %v1062_v8 = vmul.f32 %v3383_v24, %v1058_v6 }
 0x6bf   :  { %v3387_v62 = vpop.eup %3386  ;;  %v1063_v13 = vmul.f32 %v3385_v56, %v1059_v7 }
 0x6c0   :  { %v3389_v0 = vpop.eup %3388  ;;  %v924_v26 = vmul.f32 %v3387_v62, %v920_v22 }
 0x6c1   :  { %v925_v28 = vmul.f32 %v3389_v0, %v921_v25 }
 0x71e   :  { %v1067_v19 = vpop.permute.xlu0 %1066 }
 0x71f   :  { %v1072_v57 = vmul.f32 %v3383_v24, %v1067_v19  ;;  %v1069_v59 = vpop.permute.xlu1 %1068 }
 0x720   :  { %v1073_v61 = vmul.f32 %v3385_v56, %v1069_v59 }
 0x721   :  { %1076 = vrot.lane.b32.xlu0 %v1072_v57, %s3638_s6 }
 0x722   :  { %1078 = vrot.lane.b32.xlu1 %v1073_v61, %s3638_s6  ;;  %v929_v63 = vpop.permute.xlu0 %928 }
 0x723   :  { %v934_v2 = vmul.f32 %v3387_v62, %v929_v63  ;;  %v931_v3 = vpop.permute.xlu1 %930 }
 0x724   :  { %v935_v5 = vmul.f32 %v3389_v0, %v931_v3 }
 0x725   :  { %938 = vrot.lane.b32.xlu0 %v934_v2, %s3638_s6 }
 0x726   :  { %940 = vrot.lane.b32.xlu1 %v935_v5, %s3638_s6 }
 0x793   :  { %v1077_v12 = vpop.permute.xlu0 %1076 }
 0x794   :  { %v3943_v16 = vadd.f32 %v1077_v12, %v1062_v8  ;;  %v1079_v17 = vpop.permute.xlu1 %1078 }
 0x795   :  { %v3946_v23 = vadd.f32 %v1079_v17, %v1063_v13 }
 0x796   :  { %3390 = vtanh.f32 %v3943_v16 }
 0x797   :  { %3392 = vtanh.f32 %v3946_v23  ;;  %v939_v46 = vpop.permute.xlu0 %938 }
 0x798   :  { %v3951_v48 = vadd.f32 %v939_v46, %v924_v26  ;;  %v941_v29 = vpop.permute.xlu1 %940 }
 0x799   :  { %v3953_v30 = vadd.f32 %v941_v29, %v925_v28 }
 0x79a   :  { %3394 = vtanh.f32 %v3951_v48 }
 0x79b   :  { %3396 = vtanh.f32 %v3953_v30 }
 0x7a0   :  { %v3391_v20 = vpop.eup %3390 }
 0x7a1   :  { %v3393_v33 = vpop.eup %3392  ;;  %1088 = vrot.lane.b32.xlu0 %v3391_v20, %s3637_s3 }
 0x7a2   :  { %1090 = vrot.lane.b32.xlu1 %v3393_v33, %s3637_s3 }
 0x7a4   :  { %v3395_v54 = vpop.eup %3394 }
 0x7a5   :  { %v3397_v34 = vpop.eup %3396  ;;  %950 = vrot.lane.b32.xlu0 %v3395_v54, %s3637_s3 }
 0x7a6   :  { %952 = vrot.lane.b32.xlu1 %v3397_v34, %s3637_s3 }
 0x813   :  { %v1089_v38 = vpop.permute.xlu0 %1088 }
 0x814   :  { %v3961_v39 = vmul.f32 %v3383_v24, %v1089_v38  ;;  %v1091_v41 = vpop.permute.xlu1 %1090 }
 0x815   :  { %v3963_v42 = vmul.f32 %v3385_v56, %v1091_v41 }
 0x816   :  { %v1256_v44 = vrot.slane %v3961_v39, 5 }
 0x817   :  { %v1257_v45 = vrot.slane %v3963_v42, 4  ;;  %v951_v47 = vpop.permute.xlu0 %950 }
 0x818   :  { %v3967_v49 = vmul.f32 %v3387_v62, %v951_v47  ;;  %v953_v50 = vpop.permute.xlu1 %952 }
 0x819   :  { %v1258_v51 = vsel %vm525_vm2, %v1257_v45, %v1256_v44  ;;  %v3970_v9 = vmul.f32 %v3389_v0, %v953_v50 }
 0x81a   :  { %1259 = vrot.lane.b32.xlu0 %v1258_v51, %s3638_s6  ;;  %v1118_v52 = vrot.slane %v3967_v49, 2 }
 0x81b   :  { %v1119_v53 = vrot.slane %v3970_v9, 1 }
 0x81d   :  { %v1120_v55 = vsel %vm525_vm2, %v1119_v53, %v1118_v52 }
 0x81e   :  { %1121 = vrot.lane.b32.xlu1 %v1120_v55, %s3638_s6 }
 0x88c   :  { %v1260_v24 = vpop.permute.xlu0 %1259 }
 0x88d   :  { %3058 = vmatmul.mubr.msk.f32.vlgmr.msra.gmra.mrb[10].mxu1 %vm249_vm3, %v1260_v24 }
 0x88e   :  { %3234 = vmatpush3.bf16.msra.mxu1 %v3768_v18  ;;  %3079 = vmatprep.mubr.msk.f32.mxu1 %vm3635_vm1, %v3636_v15 }
 0x88f   :  { %3235 = vmatprep.subr.bf16.mxu1 %v3634_v11 }
 0x890   :  { %v1122_v19 = vpop.permute.xlu1 %1121 }
 0x891   :  { %3047 = vmatmul.mubr.msk.f32.vlgmr.msra.gmra.mrb[6].mxu0 %vm249_vm3, %v1122_v19 }
 0x892   :  { %3237 = vmatpush3.bf16.msra.mxu1 %v3781_v21  ;;  %3228 = vmatpush3.bf16.msra.mxu0 %v3739_v10 }
 0x893   :  { %3068 = vmatprep.mubr.msk.f32.mxu0 %vm3635_vm1, %v3636_v15  ;;  %3229 = vmatprep.subr.bf16.mxu0 %v3634_v11 }
 0x894   :  { %3244 = vmatprep.subr.bf16.mxu1 %v3634_v11 }
 0x896   :  { %3231 = vmatpush3.bf16.msra.mxu0 %v3751_v14 }
 0x897   :  { %3238 = vmatprep.subr.bf16.mxu0 %v3634_v11 }
 0x960   :  { %v1329_v56 = vpop.f32.mrb[10].mxu1 }
 0x961   :  { %v1334_v57 = vrot.slane %v1329_v56, 4  ;;  %v1335_v59 = vrot.slane %v1329_v56, 5  ;;  %v3059_v61 = vpop.f32.mrb[11].mxu1 }
 0x962   :  { %v1357_v61 = vrot.slane %v3946_v23, 1 }
 0x963   :  { %v1338_v62 = vadd.f32 %v1334_v57, %v3807_v36  ;;  %v1339_v63 = vadd.f32 %v1335_v59, %v3809_v40  ;;  %v1356_v59 = vrot.slane %v3943_v16, 1 }
 0x964   :  { %v1191_v0 = vpop.f32.mrb[6].mxu0 }
 0x965   :  { %3398 = vtanh.f32 %v1338_v62  ;;  %v1196_v2 = vrot.slane %v1191_v0, 5  ;;  %v1197_v3 = vrot.slane %v1191_v0, 6  ;;  %v3048_v5 = vpop.f32.mrb[7].mxu0  ;;  %v2827_v22 = vmul.f32 -1.442695, %v1338_v62 }
 0x966   :  { %3400 = vtanh.f32 %v1339_v63  ;;  %v2828_v25 = vmul.f32 -1.442695, %v1339_v63  ;;  %v1218_v5 = vrot.slane %v3951_v48, 7 }
 0x967   :  { %v1200_v6 = vadd.f32 %v1196_v2, %v3800_v31  ;;  %v1201_v7 = vadd.f32 %v1197_v3, %v3798_v27 }
 0x969   :  { %3402 = vtanh.f32 %v1200_v6  ;;  %v2824_v26 = vmul.f32 -1.442695, %v1200_v6  ;;  %v2825_v46 = vmul.f32 -1.442695, %v1201_v7 }
 0x96a   :  { %3404 = vtanh.f32 %v1201_v7  ;;  %v1219_v7 = vrot.slane %v3953_v30, 7 }
 0x96b   :  { %3406 = vpow2.f32 %v2827_v22 }
 0x96c   :  { %3408 = vpow2.f32 %v2828_v25 }
 0x96d   :  { %3410 = vpow2.f32 %v2824_v26 }
 0x96e   :  { %3412 = vpow2.f32 %v2825_v46 }
 0x96f   :  { %v3399_v8 = vpop.eup %3398 }
 0x970   :  { %v3401_v12 = vpop.eup %3400  ;;  %1364 = vrot.lane.b32.xlu0 %v3399_v8, %s3637_s3 }
 0x971   :  { %1366 = vrot.lane.b32.xlu1 %v3401_v12, %s3637_s3 }
 0x973   :  { %v3403_v13 = vpop.eup %3402 }
 0x974   :  { %v3405_v17 = vpop.eup %3404  ;;  %1226 = vrot.lane.b32.xlu0 %v3403_v13, %s3637_s3 }
 0x975   :  { %1228 = vrot.lane.b32.xlu1 %v3405_v17, %s3637_s3  ;;  %v3407_v28 = vpop.eup %3406 }
 0x976   :  { %v3409_v29 = vpop.eup %3408  ;;  %v1346_v20 = vadd.f32 1.0, %v3407_v28 }
 0x977   :  { %v1347_v33 = vadd.f32 1.0, %v3409_v29  ;;  %v3411_v54 = vpop.eup %3410 }
 0x978   :  { %v3413_v34 = vpop.eup %3412  ;;  %3414 = vrcp.f32 %v1346_v20  ;;  %v1208_v38 = vadd.f32 1.0, %v3411_v54 }
 0x979   :  { %3416 = vrcp.f32 %v1347_v33  ;;  %v1209_v41 = vadd.f32 1.0, %v3413_v34 }
 0x97a   :  { %3418 = vrcp.f32 %v1208_v38 }
 0x97b   :  { %3420 = vrcp.f32 %v1209_v41 }
 0x982   :  { %v3415_v44 = vpop.eup %3414 }
 0x983   :  { %v3417_v47 = vpop.eup %3416  ;;  %v1360_v62 = vmul.f32 %v3415_v44, %v1356_v59 }
 0x984   :  { %v3419_v53 = vpop.eup %3418  ;;  %v1361_v0 = vmul.f32 %v3417_v47, %v1357_v61 }
 0x985   :  { %v3421_v24 = vpop.eup %3420  ;;  %v1222_v8 = vmul.f32 %v3419_v53, %v1218_v5 }
 0x986   :  { %v1223_v12 = vmul.f32 %v3421_v24, %v1219_v7 }
 0x9e2   :  { %v1365_v45 = vpop.permute.xlu0 %1364 }
 0x9e3   :  { %v1370_v50 = vmul.f32 %v3415_v44, %v1365_v45  ;;  %v1367_v51 = vpop.permute.xlu1 %1366 }
 0x9e4   :  { %v1371_v52 = vmul.f32 %v3417_v47, %v1367_v51 }
 0x9e5   :  { %1374 = vrot.lane.b32.xlu0 %v1370_v50, %s3638_s6 }
 0x9e6   :  { %1376 = vrot.lane.b32.xlu1 %v1371_v52, %s3638_s6  ;;  %v1227_v55 = vpop.permute.xlu0 %1226 }
 0x9e7   :  { %v1232_v19 = vmul.f32 %v3419_v53, %v1227_v55  ;;  %v1229_v56 = vpop.permute.xlu1 %1228 }
 0x9e8   :  { %v1233_v57 = vmul.f32 %v3421_v24, %v1229_v56 }
 0x9e9   :  { %1236 = vrot.lane.b32.xlu0 %v1232_v19, %s3638_s6 }
 0x9ea   :  { %1238 = vrot.lane.b32.xlu1 %v1233_v57, %s3638_s6 }
 0xa57   :  { %v1375_v63 = vpop.permute.xlu0 %1374 }
 0xa58   :  { %v4005_v2 = vadd.f32 %v1375_v63, %v1360_v62  ;;  %v1377_v3 = vpop.permute.xlu1 %1376 }
 0xa59   :  { %v4008_v6 = vadd.f32 %v1377_v3, %v1361_v0 }
 0xa5a   :  { %3422 = vtanh.f32 %v4005_v2 }
 0xa5b   :  { %3424 = vtanh.f32 %v4008_v6  ;;  %v1237_v16 = vpop.permute.xlu0 %1236 }
 0xa5c   :  { %v4013_v23 = vadd.f32 %v1237_v16, %v1222_v8  ;;  %v1239_v13 = vpop.permute.xlu1 %1238 }
 0xa5d   :  { %v4015_v17 = vadd.f32 %v1239_v13, %v1223_v12 }
 0xa5e   :  { %3426 = vtanh.f32 %v4013_v23 }
 0xa5f   :  { %3428 = vtanh.f32 %v4015_v17 }
 0xa64   :  { %v3423_v48 = vpop.eup %3422 }
 0xa65   :  { %v3425_v22 = vpop.eup %3424  ;;  %1386 = vrot.lane.b32.xlu0 %v3423_v48, %s3637_s3 }
 0xa66   :  { %1388 = vrot.lane.b32.xlu1 %v3425_v22, %s3637_s3 }
 0xa68   :  { %v3427_v30 = vpop.eup %3426 }
 0xa69   :  { %v3429_v25 = vpop.eup %3428  ;;  %1248 = vrot.lane.b32.xlu0 %v3427_v30, %s3637_s3 }
 0xa6a   :  { %1250 = vrot.lane.b32.xlu1 %v3429_v25, %s3637_s3 }
 0xad7   :  { %v1387_v26 = vpop.permute.xlu0 %1386 }
 0xad8   :  { %v4023_v46 = vmul.f32 %v3415_v44, %v1387_v26  ;;  %v1389_v28 = vpop.permute.xlu1 %1388 }
 0xad9   :  { %v4025_v29 = vmul.f32 %v3417_v47, %v1389_v28 }
 0xada   :  { %v1554_v20 = vrot.slane %v4023_v46, 4 }
 0xadb   :  { %v1555_v33 = vrot.slane %v4025_v29, 3  ;;  %v1249_v54 = vpop.permute.xlu0 %1248 }
 0xadc   :  { %v4029_v34 = vmul.f32 %v3419_v53, %v1249_v54  ;;  %v1251_v38 = vpop.permute.xlu1 %1250 }
 0xadd   :  { %v1556_v41 = vsel %vm525_vm2, %v1555_v33, %v1554_v20  ;;  %v4032_v45 = vmul.f32 %v3421_v24, %v1251_v38 }
 0xade   :  { %1557 = vrot.lane.b32.xlu0 %v1556_v41, %s3638_s6  ;;  %v1416_v44 = vrot.slane %v4029_v34, 3 }
 0xadf   :  { %v1417_v50 = vrot.slane %v4032_v45, 2 }
 0xae1   :  { %v1418_v47 = vsel %vm525_vm2, %v1417_v50, %v1416_v44 }
 0xae2   :  { %1419 = vrot.lane.b32.xlu1 %v1418_v47, %s3638_s6 }
 0xb50   :  { %v1558_v51 = vpop.permute.xlu0 %1557 }
 0xb51   :  { %3080 = vmatmul.mubr.msk.f32.vlgmr.msra.gmra.mrb[12].mxu1 %vm249_vm3, %v1558_v51 }
 0xb52   :  { %3246 = vmatpush3.bf16.msra.mxu1 %v3768_v18  ;;  %3101 = vmatprep.mubr.msk.f32.mxu1 %vm3635_vm1, %v3636_v15 }
 0xb53   :  { %3247 = vmatprep.subr.bf16.mxu1 %v3634_v11 }
 0xb54   :  { %v1420_v52 = vpop.permute.xlu1 %1419 }
 0xb55   :  { %3069 = vmatmul.mubr.msk.f32.vlgmr.msra.gmra.mrb[8].mxu0 %vm249_vm3, %v1420_v52 }
 0xb56   :  { %3249 = vmatpush3.bf16.msra.mxu1 %v3781_v21  ;;  %3240 = vmatpush3.bf16.msra.mxu0 %v3739_v10 }
 0xb57   :  { %3090 = vmatprep.mubr.msk.f32.mxu0 %vm3635_vm1, %v3636_v15  ;;  %3241 = vmatprep.subr.bf16.mxu0 %v3634_v11 }
 0xb58   :  { %3256 = vmatprep.subr.bf16.mxu1 %v3634_v11 }
 0xb5a   :  { %3243 = vmatpush3.bf16.msra.mxu0 %v3751_v14 }
 0xb5b   :  { %3250 = vmatprep.subr.bf16.mxu0 %v3634_v11 }
 0xc24   :  { %v1627_v53 = vpop.f32.mrb[12].mxu1 }
 0xc25   :  { %v1632_v55 = vrot.slane %v1627_v53, 5  ;;  %v1633_v24 = vrot.slane %v1627_v53, 6  ;;  %v3081_v19 = vpop.f32.mrb[13].mxu1 }
 0xc27   :  { %v1636_v56 = vadd.f32 %v1632_v55, %v3807_v36  ;;  %v1637_v57 = vadd.f32 %v1633_v24, %v3809_v40 }
 0xc28   :  { %v1489_v59 = vpop.f32.mrb[8].mxu0 }
 0xc29   :  { %3430 = vtanh.f32 %v1636_v56  ;;  %v1494_v61 = vrot.slane %v1489_v59, 4  ;;  %v1495_v62 = vrot.slane %v1489_v59, 5  ;;  %v3070_v63 = vpop.f32.mrb[9].mxu0  ;;  %v2833_v12 = vmul.f32 -1.442695, %v1636_v56 }
 0xc2a   :  { %3432 = vtanh.f32 %v1637_v57  ;;  %v2834_v13 = vmul.f32 -1.442695, %v1637_v57  ;;  %v1654_v59 = vrot.slane %v4005_v2, 1 }
 0xc2b   :  { %v1498_v0 = vadd.f32 %v1494_v61, %v3800_v31  ;;  %v1499_v3 = vadd.f32 %v1495_v62, %v3798_v27  ;;  %v1655_v61 = vrot.slane %v4008_v6, 1 }
 0xc2d   :  { %3434 = vtanh.f32 %v1498_v0  ;;  %v2830_v48 = vmul.f32 -1.442695, %v1498_v0  ;;  %v2831_v22 = vmul.f32 -1.442695, %v1499_v3 }
 0xc2e   :  { %3436 = vtanh.f32 %v1499_v3 }
 0xc2f   :  { %3438 = vpow2.f32 %v2833_v12 }
 0xc30   :  { %3440 = vpow2.f32 %v2834_v13 }
 0xc31   :  { %3442 = vpow2.f32 %v2830_v48 }
 0xc32   :  { %3444 = vpow2.f32 %v2831_v22 }
 0xc33   :  { %v3431_v5 = vpop.eup %3430 }
 0xc34   :  { %v3433_v7 = vpop.eup %3432  ;;  %1662 = vrot.lane.b32.xlu0 %v3431_v5, %s3637_s3 }
 0xc35   :  { %1664 = vrot.lane.b32.xlu1 %v3433_v7, %s3637_s3  ;;  %v1516_v7 = vrot.slane %v4013_v23, 7 }
 0xc37   :  { %v3435_v8 = vpop.eup %3434 }
 0xc38   :  { %v3437_v16 = vpop.eup %3436  ;;  %1524 = vrot.lane.b32.xlu0 %v3435_v8, %s3637_s3 }
 0xc39   :  { %1526 = vrot.lane.b32.xlu1 %v3437_v16, %s3637_s3  ;;  %v3439_v30 = vpop.eup %3438  ;;  %v1517_v16 = vrot.slane %v4015_v17, 7 }
 0xc3a   :  { %v3441_v25 = vpop.eup %3440  ;;  %v1644_v26 = vadd.f32 1.0, %v3439_v30 }
 0xc3b   :  { %v1645_v28 = vadd.f32 1.0, %v3441_v25  ;;  %v3443_v20 = vpop.eup %3442 }
 0xc3c   :  { %v3445_v33 = vpop.eup %3444  ;;  %3446 = vrcp.f32 %v1644_v26  ;;  %v1506_v54 = vadd.f32 1.0, %v3443_v20 }
 0xc3d   :  { %3448 = vrcp.f32 %v1645_v28  ;;  %v1507_v38 = vadd.f32 1.0, %v3445_v33 }
 0xc3e   :  { %3450 = vrcp.f32 %v1506_v54 }
 0xc3f   :  { %3452 = vrcp.f32 %v1507_v38 }
 0xc46   :  { %v3447_v41 = vpop.eup %3446 }
 0xc47   :  { %v3449_v50 = vpop.eup %3448  ;;  %v1658_v62 = vmul.f32 %v3447_v41, %v1654_v59 }
 0xc48   :  { %v3451_v53 = vpop.eup %3450  ;;  %v1659_v0 = vmul.f32 %v3449_v50, %v1655_v61 }
 0xc49   :  { %v3453_v24 = vpop.eup %3452  ;;  %v1520_v12 = vmul.f32 %v3451_v53, %v1516_v7 }
 0xc4a   :  { %v1521_v13 = vmul.f32 %v3453_v24, %v1517_v16 }
 0xca6   :  { %v1663_v44 = vpop.permute.xlu0 %1662 }
 0xca7   :  { %v1668_v47 = vmul.f32 %v3447_v41, %v1663_v44  ;;  %v1665_v51 = vpop.permute.xlu1 %1664 }
 0xca8   :  { %v1669_v52 = vmul.f32 %v3449_v50, %v1665_v51 }
 0xca9   :  { %1672 = vrot.lane.b32.xlu0 %v1668_v47, %s3638_s6 }
 0xcaa   :  { %1674 = vrot.lane.b32.xlu1 %v1669_v52, %s3638_s6  ;;  %v1525_v55 = vpop.permute.xlu0 %1524 }
 0xcab   :  { %v1530_v19 = vmul.f32 %v3451_v53, %v1525_v55  ;;  %v1527_v56 = vpop.permute.xlu1 %1526 }
 0xcac   :  { %v1531_v57 = vmul.f32 %v3453_v24, %v1527_v56 }
 0xcad   :  { %1534 = vrot.lane.b32.xlu0 %v1530_v19, %s3638_s6 }
 0xcae   :  { %1536 = vrot.lane.b32.xlu1 %v1531_v57, %s3638_s6 }
 0xd1b   :  { %v1673_v63 = vpop.permute.xlu0 %1672 }
 0xd1c   :  { %v4067_v3 = vadd.f32 %v1673_v63, %v1658_v62  ;;  %v1675_v5 = vpop.permute.xlu1 %1674 }
 0xd1d   :  { %v4070_v8 = vadd.f32 %v1675_v5, %v1659_v0 }
 0xd1e   :  { %3454 = vtanh.f32 %v4067_v3 }
 0xd1f   :  { %3456 = vtanh.f32 %v4070_v8  ;;  %v1535_v2 = vpop.permute.xlu0 %1534 }
 0xd20   :  { %v4075_v6 = vadd.f32 %v1535_v2, %v1520_v12  ;;  %v1537_v48 = vpop.permute.xlu1 %1536 }
 0xd21   :  { %v4077_v22 = vadd.f32 %v1537_v48, %v1521_v13 }
 0xd22   :  { %3458 = vtanh.f32 %v4075_v6 }
 0xd23   :  { %3460 = vtanh.f32 %v4077_v22 }
 0xd28   :  { %v3455_v23 = vpop.eup %3454 }
 0xd29   :  { %v3457_v30 = vpop.eup %3456  ;;  %1684 = vrot.lane.b32.xlu0 %v3455_v23, %s3637_s3 }
 0xd2a   :  { %1686 = vrot.lane.b32.xlu1 %v3457_v30, %s3637_s3 }
 0xd2c   :  { %v3459_v17 = vpop.eup %3458 }
 0xd2d   :  { %v3461_v25 = vpop.eup %3460  ;;  %1546 = vrot.lane.b32.xlu0 %v3459_v17, %s3637_s3 }
 0xd2e   :  { %1548 = vrot.lane.b32.xlu1 %v3461_v25, %s3637_s3 }
 0xd9b   :  { %v1685_v26 = vpop.permute.xlu0 %1684 }
 0xd9c   :  { %v4085_v28 = vmul.f32 %v3447_v41, %v1685_v26  ;;  %v1687_v20 = vpop.permute.xlu1 %1686 }
 0xd9d   :  { %v4087_v33 = vmul.f32 %v3449_v50, %v1687_v20 }
 0xd9e   :  { %v1850_v54 = vrot.slane %v4085_v28, 3 }
 0xd9f   :  { %v1851_v38 = vrot.slane %v4087_v33, 2  ;;  %v1547_v44 = vpop.permute.xlu0 %1546 }
 0xda0   :  { %v4091_v47 = vmul.f32 %v3451_v53, %v1547_v44  ;;  %v1549_v51 = vpop.permute.xlu1 %1548 }
 0xda1   :  { %v1852_v52 = vsel %vm525_vm2, %v1851_v38, %v1850_v54  ;;  %v4094_v55 = vmul.f32 %v3453_v24, %v1549_v51 }
 0xda2   :  { %1853 = vrot.lane.b32.xlu0 %v1852_v52, %s3638_s6  ;;  %v1712_v41 = vrot.slane %v4091_v47, 4 }
 0xda3   :  { %v1713_v19 = vrot.slane %v4094_v55, 3 }
 0xda5   :  { %v1714_v50 = vsel %vm525_vm2, %v1713_v19, %v1712_v41 }
 0xda6   :  { %1715 = vrot.lane.b32.xlu1 %v1714_v50, %s3638_s6 }
 0xe14   :  { %v1854_v56 = vpop.permute.xlu0 %1853 }
 0xe15   :  { %3102 = vmatmul.mubr.msk.f32.vlgmr.msra.gmra.mrb[14].mxu1 %vm249_vm3, %v1854_v56 }
 0xe16   :  { %3258 = vmatpush3.bf16.msra.mxu1 %v3768_v18  ;;  %3123 = vmatprep.mubr.msk.f32.mxu1 %vm3635_vm1, %v3636_v15 }
 0xe17   :  { %3259 = vmatprep.subr.bf16.mxu1 %v3634_v11 }
 0xe18   :  { %v1716_v53 = vpop.permute.xlu1 %1715 }
 0xe19   :  { %3091 = vmatmul.mubr.msk.f32.vlgmr.msra.gmra.mrb[10].mxu0 %vm249_vm3, %v1716_v53 }
 0xe1a   :  { %3261 = vmatpush3.bf16.msra.mxu1 %v3781_v21  ;;  %3252 = vmatpush3.bf16.msra.mxu0 %v3739_v10 }
 0xe1b   :  { %3112 = vmatprep.mubr.msk.f32.mxu0 %vm3635_vm1, %v3636_v15  ;;  %3253 = vmatprep.subr.bf16.mxu0 %v3634_v11 }
 0xe1c   :  { %3268 = vmatprep.subr.bf16.mxu1 %v3634_v11 }
 0xe1e   :  { %3255 = vmatpush3.bf16.msra.mxu0 %v3751_v14 }
 0xe1f   :  { %3262 = vmatprep.subr.bf16.mxu0 %v3634_v11 }
 0xee8   :  { %v1923_v24 = vpop.f32.mrb[14].mxu1 }
 0xee9   :  { %v1928_v57 = vrot.slane %v1923_v24, 6  ;;  %v1929_v59 = vrot.slane %v1923_v24, 7  ;;  %v3103_v61 = vpop.f32.mrb[15].mxu1 }
 0xeeb   :  { %v1932_v62 = vadd.f32 %v1928_v57, %v3807_v36  ;;  %v1933_v63 = vadd.f32 %v1929_v59, %v3809_v40 }
 0xeec   :  { %v1785_v0 = vpop.f32.mrb[10].mxu0 }
 0xeed   :  { %3462 = vtanh.f32 %v1932_v62  ;;  %v1790_v5 = vrot.slane %v1785_v0, 3  ;;  %v1791_v7 = vrot.slane %v1785_v0, 4  ;;  %v3092_v16 = vpop.f32.mrb[11].mxu0  ;;  %v2839_v17 = vmul.f32 -1.442695, %v1932_v62 }
 0xeee   :  { %3464 = vtanh.f32 %v1933_v63  ;;  %v2840_v25 = vmul.f32 -1.442695, %v1933_v63 }
 0xeef   :  { %v1794_v12 = vadd.f32 %v1790_v5, %v3800_v31  ;;  %v1795_v2 = vadd.f32 %v1791_v7, %v3798_v27 }
 0xef1   :  { %3466 = vtanh.f32 %v1794_v12  ;;  %v2836_v26 = vmul.f32 -1.442695, %v1794_v12  ;;  %v2837_v20 = vmul.f32 -1.442695, %v1795_v2  ;;  %v1950_v12 = vrot.slane %v4067_v3, 1 }
 0xef2   :  { %3468 = vtanh.f32 %v1795_v2  ;;  %v1951_v2 = vrot.slane %v4070_v8, 1 }
 0xef3   :  { %3470 = vpow2.f32 %v2839_v17 }
 0xef4   :  { %3472 = vpow2.f32 %v2840_v25  ;;  %v1812_v25 = vrot.slane %v4075_v6, 7 }
 0xef5   :  { %3474 = vpow2.f32 %v2836_v26 }
 0xef6   :  { %3476 = vpow2.f32 %v2837_v20  ;;  %v1813_v20 = vrot.slane %v4077_v22, 7 }
 0xef7   :  { %v3463_v13 = vpop.eup %3462 }
 0xef8   :  { %v3465_v48 = vpop.eup %3464  ;;  %1958 = vrot.lane.b32.xlu0 %v3463_v13, %s3637_s3 }
 0xef9   :  { %1960 = vrot.lane.b32.xlu1 %v3465_v48, %s3637_s3 }
 0xefb   :  { %v3467_v23 = vpop.eup %3466 }
 0xefc   :  { %v3469_v30 = vpop.eup %3468  ;;  %1820 = vrot.lane.b32.xlu0 %v3467_v23, %s3637_s3 }
 0xefd   :  { %1822 = vrot.lane.b32.xlu1 %v3469_v30, %s3637_s3  ;;  %v3471_v54 = vpop.eup %3470 }
 0xefe   :  { %v3473_v38 = vpop.eup %3472  ;;  %v1940_v44 = vadd.f32 1.0, %v3471_v54 }
 0xeff   :  { %v1941_v51 = vadd.f32 1.0, %v3473_v38  ;;  %v3475_v52 = vpop.eup %3474 }
 0xf00   :  { %v3477_v41 = vpop.eup %3476  ;;  %3478 = vrcp.f32 %v1940_v44  ;;  %v1802_v19 = vadd.f32 1.0, %v3475_v52 }
 0xf01   :  { %3480 = vrcp.f32 %v1941_v51  ;;  %v1803_v50 = vadd.f32 1.0, %v3477_v41 }
 0xf02   :  { %3482 = vrcp.f32 %v1802_v19 }
 0xf03   :  { %3484 = vrcp.f32 %v1803_v50 }
 0xf0a   :  { %v3479_v56 = vpop.eup %3478 }
 0xf0b   :  { %v3481_v24 = vpop.eup %3480  ;;  %v1954_v13 = vmul.f32 %v3479_v56, %v1950_v12 }
 0xf0c   :  { %v3483_v62 = vpop.eup %3482  ;;  %v1955_v23 = vmul.f32 %v3481_v24, %v1951_v2 }
 0xf0d   :  { %v3485_v0 = vpop.eup %3484  ;;  %v1816_v54 = vmul.f32 %v3483_v62, %v1812_v25 }
 0xf0e   :  { %v1817_v38 = vmul.f32 %v3485_v0, %v1813_v20 }
 0xf6a   :  { %v1959_v53 = vpop.permute.xlu0 %1958 }
 0xf6b   :  { %v1964_v57 = vmul.f32 %v3479_v56, %v1959_v53  ;;  %v1961_v59 = vpop.permute.xlu1 %1960 }
 0xf6c   :  { %v1965_v61 = vmul.f32 %v3481_v24, %v1961_v59 }
 0xf6d   :  { %1968 = vrot.lane.b32.xlu0 %v1964_v57, %s3638_s6 }
 0xf6e   :  { %1970 = vrot.lane.b32.xlu1 %v1965_v61, %s3638_s6  ;;  %v1821_v63 = vpop.permute.xlu0 %1820 }
 0xf6f   :  { %v1826_v5 = vmul.f32 %v3483_v62, %v1821_v63  ;;  %v1823_v7 = vpop.permute.xlu1 %1822 }
 0xf70   :  { %v1827_v16 = vmul.f32 %v3485_v0, %v1823_v7 }
 0xf71   :  { %1830 = vrot.lane.b32.xlu0 %v1826_v5, %s3638_s6 }
 0xf72   :  { %1832 = vrot.lane.b32.xlu1 %v1827_v16, %s3638_s6 }
 0xfdf   :  { %v1969_v48 = vpop.permute.xlu0 %1968 }
 0xfe0   :  { %v4129_v30 = vadd.f32 %v1969_v48, %v1954_v13  ;;  %v1971_v17 = vpop.permute.xlu1 %1970 }
 0xfe1   :  { %v4132_v26 = vadd.f32 %v1971_v17, %v1955_v23 }
 0xfe2   :  { %3486 = vtanh.f32 %v4129_v30 }
 0xfe3   :  { %3488 = vtanh.f32 %v4132_v26  ;;  %v1831_v3 = vpop.permute.xlu0 %1830 }
 0xfe4   :  { %v4137_v8 = vadd.f32 %v1831_v3, %v1816_v54  ;;  %v1833_v44 = vpop.permute.xlu1 %1832 }
 0xfe5   :  { %v4139_v51 = vadd.f32 %v1833_v44, %v1817_v38 }
 0xfe6   :  { %3490 = vtanh.f32 %v4137_v8 }
 0xfe7   :  { %3492 = vtanh.f32 %v4139_v51 }
 0xfec   :  { %v3487_v6 = vpop.eup %3486 }
 0xfed   :  { %v3489_v52 = vpop.eup %3488  ;;  %1980 = vrot.lane.b32.xlu0 %v3487_v6, %s3637_s3 }
 0xfee   :  { %1982 = vrot.lane.b32.xlu1 %v3489_v52, %s3637_s3 }
 0xff0   :  { %v3491_v22 = vpop.eup %3490 }
 0xff1   :  { %v3493_v41 = vpop.eup %3492  ;;  %1842 = vrot.lane.b32.xlu0 %v3491_v22, %s3637_s3 }
 0xff2   :  { %1844 = vrot.lane.b32.xlu1 %v3493_v41, %s3637_s3 }
0x105f   :  { %v1981_v19 = vpop.permute.xlu0 %1980 }
0x1060   :  { %v4147_v50 = vmul.f32 %v3479_v56, %v1981_v19  ;;  %v1983_v53 = vpop.permute.xlu1 %1982 }
0x1061   :  { %v4149_v57 = vmul.f32 %v3481_v24, %v1983_v53 }
0x1062   :  { %v2146_v59 = vrot.slane %v4147_v50, 2 }
0x1063   :  { %v2147_v61 = vrot.slane %v4149_v57, 1  ;;  %v1843_v63 = vpop.permute.xlu0 %1842 }
0x1064   :  { %v4153_v5 = vmul.f32 %v3483_v62, %v1843_v63  ;;  %v1845_v7 = vpop.permute.xlu1 %1844 }
0x1065   :  { %v2148_v16 = vsel %vm525_vm2, %v2147_v61, %v2146_v59  ;;  %v4156_v12 = vmul.f32 %v3485_v0, %v1845_v7 }
0x1066   :  { %2149 = vrot.lane.b32.xlu0 %v2148_v16, %s3638_s6  ;;  %v2008_v56 = vrot.slane %v4153_v5, 5 }
0x1067   :  { %v2009_v2 = vrot.slane %v4156_v12, 4 }
0x1069   :  { %v2010_v24 = vsel %vm525_vm2, %v2009_v2, %v2008_v56 }
0x106a   :  { %2011 = vrot.lane.b32.xlu1 %v2010_v24, %s3638_s6 }
0x10d8   :  { %v2150_v13 = vpop.permute.xlu0 %2149 }
0x10d9   :  { %3124 = vmatmul.mubr.msk.f32.vlgmr.msra.gmra.mrb[16].mxu1 %vm249_vm3, %v2150_v13 }
0x10da   :  { %3270 = vmatpush3.bf16.msra.mxu1 %v3768_v18  ;;  %3145 = vmatprep.mubr.msk.f32.mxu1 %vm3635_vm1, %v3636_v15 }
0x10db   :  { %3271 = vmatprep.subr.bf16.mxu1 %v3634_v11 }
0x10dc   :  { %v2012_v62 = vpop.permute.xlu1 %2011 }
0x10dd   :  { %3113 = vmatmul.mubr.msk.f32.vlgmr.msra.gmra.mrb[12].mxu0 %vm249_vm3, %v2012_v62 }
0x10de   :  { %3273 = vmatpush3.bf16.msra.mxu1 %v3781_v21  ;;  %3264 = vmatpush3.bf16.msra.mxu0 %v3739_v10 }
0x10df   :  { %3134 = vmatprep.mubr.msk.f32.mxu0 %vm3635_vm1, %v3636_v15  ;;  %3265 = vmatprep.subr.bf16.mxu0 %v3634_v11 }
0x10e2   :  { %3267 = vmatpush3.bf16.msra.mxu0 %v3751_v14 }
0x11ac   :  { %v2219_v18 = vpop.f32.mrb[16].mxu1 }
0x11ad   :  { %v2224_v0 = vrot.slane %v2219_v18, 7  ;;  %v2228_v48 = vadd.f32 %v2219_v18, %v3809_v40  ;;  %v3125_v23 = vpop.f32.mrb[17].mxu1 }
0x11af   :  { %v2227_v17 = vadd.f32 %v2224_v0, %v3807_v36  ;;  %3494 = vtanh.f32 %v2228_v48  ;;  %v2846_v44 = vmul.f32 -1.442695, %v2228_v48 }
0x11b0   :  { %v2081_v25 = vpop.f32.mrb[12].mxu0 }
0x11b1   :  { %3496 = vtanh.f32 %v2227_v17  ;;  %v2086_v21 = vrot.slane %v2081_v25, 2  ;;  %v2087_v20 = vrot.slane %v2081_v25, 3  ;;  %v3114_v10 = vpop.f32.mrb[13].mxu0  ;;  %v2845_v6 = vmul.f32 -1.442695, %v2227_v17 }
0x11b3   :  { %v2090_v54 = vadd.f32 %v2086_v21, %v3800_v31  ;;  %v2091_v15 = vadd.f32 %v2087_v20, %v3798_v27  ;;  %v2246_v20 = vrot.slane %v4132_v26, 1 }
0x11b5   :  { %3498 = vtanh.f32 %v2090_v54  ;;  %v2842_v52 = vmul.f32 -1.442695, %v2090_v54  ;;  %v2843_v22 = vmul.f32 -1.442695, %v2091_v15  ;;  %v2245_v54 = vrot.slane %v4129_v30, 1 }
0x11b6   :  { %3500 = vtanh.f32 %v2091_v15 }
0x11b7   :  { %3502 = vpow2.f32 %v2846_v44 }
0x11b8   :  { %3504 = vpow2.f32 %v2845_v6  ;;  %v2109_v6 = vrot.slane %v4139_v51, 7 }
0x11b9   :  { %v3495_v11 = vpop.eup %3494  ;;  %3506 = vpow2.f32 %v2842_v52 }
0x11ba   :  { %2255 = vrot.lane.b32.xlu1 %v3495_v11, %s3637_s3  ;;  %3508 = vpow2.f32 %v2843_v22 }
0x11bb   :  { %v3497_v14 = vpop.eup %3496 }
0x11bc   :  { %2253 = vrot.lane.b32.xlu0 %v3497_v14, %s3637_s3 }
0x11bf   :  { %v3499_v3 = vpop.eup %3498 }
0x11c0   :  { %v3501_v38 = vpop.eup %3500  ;;  %2116 = vrot.lane.b32.xlu0 %v3499_v3, %s3637_s3 }
0x11c1   :  { %2118 = vrot.lane.b32.xlu1 %v3501_v38, %s3637_s3  ;;  %v3503_v41 = vpop.eup %3502  ;;  %v2108_v38 = vrot.slane %v4137_v8, 7 }
0x11c2   :  { %v3505_v19 = vpop.eup %3504  ;;  %v2236_v53 = vadd.f32 1.0, %v3503_v41 }
0x11c3   :  { %v2235_v59 = vadd.f32 1.0, %v3505_v19  ;;  %v3507_v61 = vpop.eup %3506 }
0x11c4   :  { %3510 = vrcp.f32 %v2236_v53  ;;  %v3509_v63 = vpop.eup %3508  ;;  %v2098_v7 = vadd.f32 1.0, %v3507_v61 }
0x11c5   :  { %3512 = vrcp.f32 %v2235_v59  ;;  %v2099_v16 = vadd.f32 1.0, %v3509_v63 }
0x11c6   :  { %3514 = vrcp.f32 %v2098_v7 }
0x11c7   :  { %3516 = vrcp.f32 %v2099_v16 }
0x11ce   :  { %v3511_v56 = vpop.eup %3510 }
0x11cf   :  { %v3513_v13 = vpop.eup %3512  ;;  %v2250_v10 = vmul.f32 %v3511_v56, %v2246_v20 }
0x11d0   :  { %v3515_v0 = vpop.eup %3514  ;;  %v2249_v14 = vmul.f32 %v3513_v13, %v2245_v54 }
0x11d1   :  { %v3517_v23 = vpop.eup %3516  ;;  %v2112_v52 = vmul.f32 %v3515_v0, %v2108_v38 }
0x11d2   :  { %v2113_v22 = vmul.f32 %v3517_v23, %v2109_v6 }
0x122c   :  { %v2256_v2 = vpop.permute.xlu1 %2255 }
0x122d   :  { %v2260_v24 = vmul.f32 %v3511_v56, %v2256_v2 }
0x122e   :  { %v2254_v62 = vpop.permute.xlu0 %2253 }
0x122f   :  { %2265 = vrot.lane.b32.xlu1 %v2260_v24, %s3638_s6  ;;  %v2259_v18 = vmul.f32 %v3513_v13, %v2254_v62 }
0x1231   :  { %2263 = vrot.lane.b32.xlu0 %v2259_v18, %s3638_s6 }
0x1232   :  { %v2117_v48 = vpop.permute.xlu0 %2116 }
0x1233   :  { %v2122_v17 = vmul.f32 %v3515_v0, %v2117_v48  ;;  %v2119_v25 = vpop.permute.xlu1 %2118 }
0x1234   :  { %v2123_v21 = vmul.f32 %v3517_v23, %v2119_v25 }
0x1235   :  { %2126 = vrot.lane.b32.xlu0 %v2122_v17, %s3638_s6 }
0x1236   :  { %2128 = vrot.lane.b32.xlu1 %v2123_v21, %s3638_s6 }
0x12a1   :  { %v2266_v15 = vpop.permute.xlu1 %2265 }
0x12a2   :  { %v4189_v11 = vadd.f32 %v2266_v15, %v2250_v10 }
0x12a3   :  { %v2264_v3 = vpop.permute.xlu0 %2263 }
0x12a4   :  { %3518 = vtanh.f32 %v4189_v11  ;;  %v4193_v44 = vadd.f32 %v2264_v3, %v2249_v14 }
0x12a6   :  { %3520 = vtanh.f32 %v4193_v44 }
0x12a7   :  { %v2127_v26 = vpop.permute.xlu0 %2126 }
0x12a8   :  { %v4197_v41 = vadd.f32 %v2127_v26, %v2112_v52  ;;  %v2129_v30 = vpop.permute.xlu1 %2128 }
0x12a9   :  { %v4199_v19 = vadd.f32 %v2129_v30, %v2113_v22 }
0x12aa   :  { %3522 = vtanh.f32 %v4197_v41 }
0x12ab   :  { %3524 = vtanh.f32 %v4199_v19 }
0x12ae   :  { %v3519_v53 = vpop.eup %3518 }
0x12af   :  { %2277 = vrot.lane.b32.xlu1 %v3519_v53, %s3637_s3 }
0x12b0   :  { %v3521_v8 = vpop.eup %3520 }
0x12b1   :  { %2275 = vrot.lane.b32.xlu0 %v3521_v8, %s3637_s3 }
0x12b4   :  { %v3523_v51 = vpop.eup %3522 }
0x12b5   :  { %v3525_v59 = vpop.eup %3524  ;;  %2138 = vrot.lane.b32.xlu0 %v3523_v51, %s3637_s3 }
0x12b6   :  { %2140 = vrot.lane.b32.xlu1 %v3525_v59, %s3637_s3 }
0x1321   :  { %v2278_v61 = vpop.permute.xlu1 %2277 }
0x1322   :  { %v4209_v16 = vmul.f32 %v3511_v56, %v2278_v61 }
0x1323   :  { %v2276_v63 = vpop.permute.xlu0 %2275 }
0x1324   :  { %v4207_v7 = vmul.f32 %v3513_v13, %v2276_v63 }
0x1326   :  { %v2441_v2 = vrot.slane %v4207_v7, 1 }
0x1327   :  { %v2139_v24 = vpop.permute.xlu0 %2138 }
0x1328   :  { %v4212_v62 = vmul.f32 %v3515_v0, %v2139_v24  ;;  %v2141_v18 = vpop.permute.xlu1 %2140  ;;  %v2442_v48 = vsel %vm525_vm2, %v4209_v16, %v2441_v2 }
0x1329   :  { %v4216_v17 = vmul.f32 %v3517_v23, %v2141_v18  ;;  %2443 = vrot.lane.b32.xlu0 %v2442_v48, %s3638_s6 }
0x132a   :  { %v2303_v25 = vrot.slane %v4212_v62, 6 }
0x132b   :  { %v2304_v13 = vrot.slane %v4216_v17, 5 }
0x132d   :  { %v2305_v56 = vsel %vm525_vm2, %v2304_v13, %v2303_v25 }
0x132e   :  { %2306 = vrot.lane.b32.xlu1 %v2305_v56, %s3638_s6 }
0x139b   :  { %v2444_v21 = vpop.permute.xlu0 %2443 }
0x139c   :  { %3146 = vmatmul.mubr.msk.f32.vlgmr.msra.gmra.mrb[18].mxu1 %vm249_vm3, %v2444_v21 }
0x13a0   :  { %v2307_v0 = vpop.permute.xlu1 %2306 }
0x13a1   :  { %3135 = vmatmul.mubr.msk.f32.vlgmr.msra.gmra.mrb[14].mxu0 %vm249_vm3, %v2307_v0 }
0x146f   :  { %v2513_v20 = vpop.f32.mrb[18].mxu1 }
0x1470   :  { %v2518_v10 = vrot.slane %v2513_v20, 1  ;;  %v2521_v23 = vadd.f32 %v2513_v20, %v3807_v36  ;;  %v3147_v54 = vpop.f32.mrb[19].mxu1 }
0x1472   :  { %v2522_v15 = vadd.f32 %v2518_v10, %v3809_v40  ;;  %3526 = vtanh.f32 %v2521_v23  ;;  %v2851_v53 = vmul.f32 -1.442695, %v2521_v23 }
0x1474   :  { %v2376_v14 = vpop.f32.mrb[14].mxu0  ;;  %3528 = vtanh.f32 %v2522_v15  ;;  %v2852_v8 = vmul.f32 -1.442695, %v2522_v15 }
0x1475   :  { %v2381_v3 = vrot.slane %v2376_v14, 1  ;;  %v2382_v38 = vrot.slane %v2376_v14, 2  ;;  %v3136_v6 = vpop.f32.mrb[15].mxu0 }
0x1477   :  { %v2385_v52 = vadd.f32 %v2381_v3, %v3800_v31  ;;  %v2386_v26 = vadd.f32 %v2382_v38, %v3798_v27  ;;  %v2539_v38 = vrot.slane %v4193_v44, 1 }
0x1479   :  { %3530 = vtanh.f32 %v2385_v52  ;;  %v2848_v31 = vmul.f32 -1.442695, %v2385_v52  ;;  %v2849_v27 = vmul.f32 -1.442695, %v2386_v26  ;;  %v2540_v52 = vrot.slane %v4189_v11, 1 }
0x147a   :  { %3532 = vtanh.f32 %v2386_v26 }
0x147b   :  { %3534 = vpow2.f32 %v2851_v53 }
0x147c   :  { %v3527_v22 = vpop.eup %3526  ;;  %3536 = vpow2.f32 %v2852_v8  ;;  %v2404_v8 = vrot.slane %v4199_v19, 7 }
0x147d   :  { %2547 = vrot.lane.b32.xlu0 %v3527_v22, %s3637_s3  ;;  %3538 = vpow2.f32 %v2848_v31 }
0x147e   :  { %v3529_v30 = vpop.eup %3528  ;;  %3540 = vpow2.f32 %v2849_v27 }
0x147f   :  { %2549 = vrot.lane.b32.xlu1 %v3529_v30, %s3637_s3 }
0x1483   :  { %v3531_v36 = vpop.eup %3530 }
0x1484   :  { %v3533_v40 = vpop.eup %3532  ;;  %2411 = vrot.lane.b32.xlu0 %v3531_v36, %s3637_s3 }
0x1485   :  { %2413 = vrot.lane.b32.xlu1 %v3533_v40, %s3637_s3  ;;  %v3535_v51 = vpop.eup %3534  ;;  %v2403_v40 = vrot.slane %v4197_v41, 7 }
0x1486   :  { %v3537_v59 = vpop.eup %3536  ;;  %v2529_v61 = vadd.f32 1.0, %v3535_v51 }
0x1487   :  { %v2530_v63 = vadd.f32 1.0, %v3537_v59  ;;  %v3539_v2 = vpop.eup %3538 }
0x1488   :  { %3542 = vrcp.f32 %v2529_v61  ;;  %v3541_v24 = vpop.eup %3540  ;;  %v2393_v18 = vadd.f32 1.0, %v3539_v2 }
0x1489   :  { %3544 = vrcp.f32 %v2530_v63  ;;  %v2394_v48 = vadd.f32 1.0, %v3541_v24 }
0x148a   :  { %3546 = vrcp.f32 %v2393_v18 }
0x148b   :  { %3548 = vrcp.f32 %v2394_v48 }
0x1492   :  { %v4233_v25 = vpop.eup %3542 }
0x1493   :  { %v4236_v21 = vpop.eup %3544  ;;  %v2543_v6 = vmul.f32 %v4233_v25, %v2539_v38 }
0x1494   :  { %v4241_v10 = vpop.eup %3546  ;;  %v2544_v30 = vmul.f32 %v4236_v21, %v2540_v52 }
0x1495   :  { %v4243_v54 = vpop.eup %3548  ;;  %v2407_v31 = vmul.f32 %v4241_v10, %v2403_v40 }
0x1496   :  { %v2408_v44 = vmul.f32 %v4243_v54, %v2404_v8 }
0x14ef   :  { %v2548_v13 = vpop.permute.xlu0 %2547 }
0x14f0   :  { %v2553_v56 = vmul.f32 %v4233_v25, %v2548_v13 }
0x14f1   :  { %v2550_v0 = vpop.permute.xlu1 %2549 }
0x14f2   :  { %2557 = vrot.lane.b32.xlu0 %v2553_v56, %s3638_s6  ;;  %v2554_v20 = vmul.f32 %v4236_v21, %v2550_v0 }
0x14f4   :  { %2559 = vrot.lane.b32.xlu1 %v2554_v20, %s3638_s6 }
0x14f6   :  { %v2412_v23 = vpop.permute.xlu0 %2411 }
0x14f7   :  { %v2417_v15 = vmul.f32 %v4241_v10, %v2412_v23  ;;  %v2414_v14 = vpop.permute.xlu1 %2413 }
0x14f8   :  { %v2418_v3 = vmul.f32 %v4243_v54, %v2414_v14 }
0x14f9   :  { %2421 = vrot.lane.b32.xlu0 %v2417_v15, %s3638_s6 }
0x14fa   :  { %2423 = vrot.lane.b32.xlu1 %v2418_v3, %s3638_s6 }
0x1564   :  { %v2558_v26 = vpop.permute.xlu0 %2557 }
0x1565   :  { %v2563_v22 = vadd.f32 %v2558_v26, %v2543_v6 }
0x1566   :  { %v2560_v36 = vpop.permute.xlu1 %2559 }
0x1567   :  { %3550 = vtanh.f32 %v2563_v22  ;;  %v2564_v53 = vadd.f32 %v2560_v36, %v2544_v30  ;;  %v2603_v30 = vld [vmem:[%s4414_s7 + $0x10] sm:$0xff]  ;;  %v2604_v36 = vld [vmem:[%s4414_s7 + $0x18] sm:$0xff] }
0x1568   :  { %v3286_v40 = vpack.c.bf16 %v2604_v36, %v2603_v30 }
0x1569   :  { %3552 = vtanh.f32 %v2564_v53 }
0x156b   :  { %v2422_v27 = vpop.permute.xlu0 %2421 }
0x156c   :  { %v2427_v51 = vadd.f32 %v2422_v27, %v2407_v31  ;;  %v2424_v59 = vpop.permute.xlu1 %2423 }
0x156d   :  { %v2428_v11 = vadd.f32 %v2424_v59, %v2408_v44  ;;  %v2857_v44 = vld [vmem:[%s4416_s9] ss:$0 sm:$0xff] }
0x156e   :  { %3554 = vtanh.f32 %v2427_v51 }
0x156f   :  { %3556 = vtanh.f32 %v2428_v11 }
0x1571   :  { %v3551_v61 = vpop.eup %3550 }
0x1572   :  { %2569 = vrot.lane.b32.xlu0 %v3551_v61, %s3637_s3 }
0x1573   :  { %v3553_v63 = vpop.eup %3552 }
0x1574   :  { %2571 = vrot.lane.b32.xlu1 %v3553_v63, %s3637_s3 }
0x1578   :  { %v3555_v41 = vpop.eup %3554 }
0x1579   :  { %v3557_v2 = vpop.eup %3556  ;;  %2433 = vrot.lane.b32.xlu0 %v3555_v41, %s3637_s3 }
0x157a   :  { %2435 = vrot.lane.b32.xlu1 %v3557_v2, %s3637_s3 }
0x157d   :  { %515 = vrot.lane.b32.xlu0 %v3837_v32, %s3638_s6  ;;  %v2605_v32 = vld [vmem:[%s4415_s8] sm:$0xff] }
0x157e   :  { %812 = vrot.lane.b32.xlu1 %v3899_v58, %s3638_s6 }
0x1581   :  { %1109 = vrot.lane.b32.xlu0 %v3961_v39, %s3638_s6 }
0x1582   :  { %1407 = vrot.lane.b32.xlu1 %v4023_v46, %s3638_s6  ;;  %v2602_v46 = vld [vmem:[%s4414_s7 + $0x8] sm:$0xff] }
0x1585   :  { %1704 = vrot.lane.b32.xlu0 %v4085_v28, %s3638_s6 }
0x1586   :  { %2000 = vrot.lane.b32.xlu1 %v4147_v50, %s3638_s6 }
0x1589   :  { %2295 = vrot.lane.b32.xlu0 %v4207_v7, %s3638_s6 }
0x158a   :  { %814 = vrot.lane.b32.xlu1 %v3901_v60, %s3638_s6  ;;  %v2607_v60 = vld [vmem:[%s4415_s8 + $0x10] sm:$0xff] }
0x158d   :  { %517 = vrot.lane.b32.xlu0 %v3841_v37, %s3638_s6  ;;  %v2606_v37 = vld [vmem:[%s4415_s8 + $0x8] sm:$0xff] }
0x158e   :  { %1409 = vrot.lane.b32.xlu1 %v4025_v29, %s3638_s6 }
0x1591   :  { %1111 = vrot.lane.b32.xlu0 %v3963_v42, %s3638_s6 }
0x1592   :  { %2002 = vrot.lane.b32.xlu1 %v4149_v57, %s3638_s6 }
0x1595   :  { %1706 = vrot.lane.b32.xlu0 %v4087_v33, %s3638_s6 }
0x1596   :  { %801 = vrot.lane.b32.xlu1 %v3906_v1, %s3638_s6  ;;  %v2608_v1 = vld [vmem:[%s4415_s8 + $0x18] sm:$0xff] }
0x1599   :  { %2297 = vrot.lane.b32.xlu0 %v4209_v16, %s3638_s6 }
0x159a   :  { %1396 = vrot.lane.b32.xlu1 %v4029_v34, %s3638_s6 }
0x159d   :  { %504 = vrot.lane.b32.xlu0 %v3846_v43, %s3638_s6  ;;  %v3274_v43 = vpack.c.bf16 %v2606_v37, %v2605_v32 }
0x159e   :  { %1990 = vrot.lane.b32.xlu1 %v4153_v5, %s3638_s6 }
0x159f   :  { %3275 = vmatprep.subr.bf16.mxu0 %v3274_v43 }
0x15a0   :  { %3277 = vmatpush3.bf16.msra.mxu0 %v3274_v43 }
0x15a1   :  { %1098 = vrot.lane.b32.xlu0 %v3967_v49, %s3638_s6 }
0x15a2   :  { %803 = vrot.lane.b32.xlu1 %v3910_v4, %s3638_s6  ;;  %v3278_v4 = vpack.c.bf16 %v2608_v1, %v2607_v60 }
0x15a4   :  { %3279 = vmatprep.subr.bf16.mxu0 %v3278_v4 }
0x15a5   :  { %1694 = vrot.lane.b32.xlu0 %v4091_v47, %s3638_s6  ;;  %3281 = vmatpush3.bf16.msra.mxu0 %v3278_v4 }
0x15a6   :  { %1398 = vrot.lane.b32.xlu1 %v4032_v45, %s3638_s6 }
0x15a9   :  { %2285 = vrot.lane.b32.xlu0 %v4212_v62, %s3638_s6 }
0x15ad   :  { %506 = vrot.lane.b32.xlu0 %v3839_v35, %s3638_s6 }
0x15b1   :  { %1100 = vrot.lane.b32.xlu0 %v3970_v9, %s3638_s6  ;;  %v2601_v9 = vld [vmem:[%s4414_s7] sm:$0xff] }
0x15b2   :  { %v4335_v29 = vpack.c.bf16 %v2602_v46, %v2601_v9 }
0x15b4   :  { %3283 = vmatprep.subr.bf16.mxu0 %v4335_v29 }
0x15b5   :  { %1696 = vrot.lane.b32.xlu0 %v4094_v55, %s3638_s6 }
0x15b9   :  { %2287 = vrot.lane.b32.xlu0 %v4216_v17, %s3638_s6 }
0x15e4   :  { %v2570_v58 = vpop.permute.xlu0 %2569 }
0x15e5   :  { %v2575_v45 = vmul.f32 %v4233_v25, %v2570_v58 }
0x15e6   :  { %v2572_v35 = vpop.permute.xlu1 %2571 }
0x15e7   :  { %v2576_v47 = vmul.f32 %v4236_v21, %v2572_v35 }
0x15eb   :  { %v2434_v39 = vpop.permute.xlu0 %2433 }
0x15ec   :  { %v2439_v42 = vmul.f32 %v4241_v10, %v2434_v39  ;;  %v2436_v49 = vpop.permute.xlu1 %2435 }
0x15ed   :  { %v2440_v19 = vmul.f32 %v4243_v54, %v2436_v49 }
0x15ee   :  { %2579 = vrot.lane.b32.xlu1 %v2439_v42, %s3638_s6 }
0x15ef   :  { %v516_v34 = vpop.permute.xlu0 %515 }
0x15f0   :  { %522 = vst.msk [vmem:[#allocation3] sm:$0x80] %vm521_vm4, %v516_v34  ;;  %v813_v28 = vpop.permute.xlu1 %812 }
0x15f1   :  { %819 = vst.msk [vmem:[#allocation3] sm:$0x40] %vm818_vm5, %v813_v28 }
0x15f2   :  { %2589 = vrot.lane.b32.xlu1 %v2575_v45, %s3638_s6 }
0x15f3   :  { %v1110_v33 = vpop.permute.xlu0 %1109 }
0x15f4   :  { %1116 = vst.msk [vmem:[#allocation3] sm:$0x20] %vm1115_vm6, %v1110_v33  ;;  %v1408_v55 = vpop.permute.xlu1 %1407 }
0x15f5   :  { %1414 = vst.msk [vmem:[#allocation3] sm:$0x10] %vm1413_vm7, %v1408_v55 }
0x15f6   :  { %2591 = vrot.lane.b32.xlu1 %v2576_v47, %s3638_s6 }
0x15f7   :  { %v1705_v50 = vpop.permute.xlu0 %1704 }
0x15f8   :  { %1710 = vst.msk [vmem:[#allocation3] sm:$0x8] %vm1402_vm8, %v1705_v50  ;;  %v2001_v57 = vpop.permute.xlu1 %2000 }
0x15f9   :  { %2006 = vst.msk [vmem:[#allocation3] sm:$0x4] %vm1104_vm9, %v2001_v57 }
0x15fa   :  { %1992 = vrot.lane.b32.xlu1 %v4156_v12, %s3638_s6 }
0x15fb   :  { %v2296_v5 = vpop.permute.xlu0 %2295 }
0x15fc   :  { %2301 = vst.msk [vmem:[#allocation3] sm:$0x2] %vm807_vm10, %v2296_v5  ;;  %v815_v7 = vpop.permute.xlu1 %814 }
0x15fd   :  { %820 = vst.msk [vmem:[#allocation3 + $0x8] sm:$0x40] %vm818_vm5, %v815_v7 }
0x15fe   :  { %2581 = vrot.lane.b32.xlu1 %v2440_v19, %s3638_s6 }
0x15ff   :  { %v518_v16 = vpop.permute.xlu0 %517 }
0x1600   :  { %523 = vst.msk [vmem:[#allocation3 + $0x8] sm:$0x80] %vm521_vm4, %v518_v16  ;;  %v1410_v62 = vpop.permute.xlu1 %1409 }
0x1601   :  { %1415 = vst.msk [vmem:[#allocation3 + $0x8] sm:$0x10] %vm1413_vm7, %v1410_v62 }
0x1603   :  { %v1112_v17 = vpop.permute.xlu0 %1111 }
0x1604   :  { %1117 = vst.msk [vmem:[#allocation3 + $0x8] sm:$0x20] %vm1115_vm6, %v1112_v17  ;;  %v2003_v12 = vpop.permute.xlu1 %2002 }
0x1605   :  { %2007 = vst.msk [vmem:[#allocation3 + $0x8] sm:$0x4] %vm1104_vm9, %v2003_v12 }
0x1607   :  { %v1707_v24 = vpop.permute.xlu0 %1706 }
0x1608   :  { %1711 = vst.msk [vmem:[#allocation3 + $0x8] sm:$0x8] %vm1402_vm8, %v1707_v24  ;;  %v802_v18 = vpop.permute.xlu1 %801 }
0x1609   :  { %808 = vst.msk [vmem:[#allocation2] sm:$0x2] %vm807_vm10, %v802_v18 }
0x160b   :  { %v2298_v48 = vpop.permute.xlu0 %2297 }
0x160c   :  { %2302 = vst.msk [vmem:[#allocation3 + $0x8] sm:$0x2] %vm807_vm10, %v2298_v48  ;;  %v1397_v25 = vpop.permute.xlu1 %1396 }
0x160d   :  { %1403 = vst.msk [vmem:[#allocation2] sm:$0x8] %vm1402_vm8, %v1397_v25 }
0x160f   :  { %v505_v13 = vpop.permute.xlu0 %504 }
0x1610   :  { %511 = vst.msk [vmem:[#allocation2] sm:$0x1] %vm510_vm11, %v505_v13  ;;  %v1991_v56 = vpop.permute.xlu1 %1990 }
0x1611   :  { %1996 = vst.msk [vmem:[#allocation2] sm:$0x20] %vm1115_vm6, %v1991_v56 }
0x1613   :  { %v1099_v21 = vpop.permute.xlu0 %1098 }
0x1614   :  { %1105 = vst.msk [vmem:[#allocation2] sm:$0x4] %vm1104_vm9, %v1099_v21  ;;  %v804_v0 = vpop.permute.xlu1 %803 }
0x1615   :  { %809 = vst.msk [vmem:[#allocation2 + $0x8] sm:$0x2] %vm807_vm10, %v804_v0 }
0x1617   :  { %v1695_v20 = vpop.permute.xlu0 %1694 }
0x1618   :  { %1700 = vst.msk [vmem:[#allocation2] sm:$0x10] %vm1413_vm7, %v1695_v20  ;;  %v1399_v10 = vpop.permute.xlu1 %1398 }
0x1619   :  { %1404 = vst.msk [vmem:[#allocation2 + $0x8] sm:$0x8] %vm1402_vm8, %v1399_v10 }
0x161b   :  { %v2286_v23 = vpop.permute.xlu0 %2285 }
0x161c   :  { %2291 = vst.msk [vmem:[#allocation2] sm:$0x40] %vm818_vm5, %v2286_v23 }
0x161f   :  { %v507_v54 = vpop.permute.xlu0 %506 }
0x1620   :  { %512 = vst.msk [vmem:[#allocation2 + $0x8] sm:$0x1] %vm510_vm11, %v507_v54 }
0x1623   :  { %v1101_v15 = vpop.permute.xlu0 %1100 }
0x1624   :  { %1106 = vst.msk [vmem:[#allocation2 + $0x8] sm:$0x4] %vm1104_vm9, %v1101_v15 }
0x1627   :  { %v1697_v14 = vpop.permute.xlu0 %1696 }
0x1628   :  { %1701 = vst.msk [vmem:[#allocation2 + $0x8] sm:$0x10] %vm1413_vm7, %v1697_v14 }
0x162b   :  { %v2288_v3 = vpop.permute.xlu0 %2287 }
0x162c   :  { %2292 = vst.msk [vmem:[#allocation2 + $0x8] sm:$0x40] %vm818_vm5, %v2288_v3 }
0x1660   :  { %v2580_v38 = vpop.permute.xlu1 %2579 }
0x1661   :  { %2585 = vst.msk [vmem:[#allocation2] sm:$0x80] %vm521_vm4, %v2580_v38 }
0x1664   :  { %v2590_v6 = vpop.permute.xlu1 %2589 }
0x1665   :  { %2595 = vst.msk [vmem:[#allocation3] sm:$0x1] %vm510_vm11, %v2590_v6 }
0x1668   :  { %v2592_v52 = vpop.permute.xlu1 %2591  ;;  %v2597_v31 = vld [vmem:[#allocation2] sm:$0xff] }
0x1669   :  { %2596 = vst.msk [vmem:[#allocation3 + $0x8] sm:$0x1] %vm510_vm11, %v2592_v52 }
0x166c   :  { %v1993_v26 = vpop.permute.xlu1 %1992  ;;  %v2599_v22 = vld [vmem:[#allocation3] sm:$0xff] }
0x166d   :  { %1997 = vst.msk [vmem:[#allocation2 + $0x8] sm:$0x20] %vm1115_vm6, %v1993_v26  ;;  %3156 = vmatprep.mubr.msk.f32.mxu0 %vm249_vm3, %v2599_v22 }
0x1670   :  { %v2582_v53 = vpop.permute.xlu1 %2581  ;;  %v2600_v8 = vld [vmem:[#allocation3 + $0x8] sm:$0xff] }
0x1671   :  { %2586 = vst.msk [vmem:[#allocation2 + $0x8] sm:$0x80] %vm521_vm4, %v2582_v53  ;;  %3157 = vmatmul.mubr.msk.f32.vlgmr.msra.gmra.mrb[16].mxu0 %vm249_vm3, %v2600_v8 }
0x1672   :  { %3285 = vmatpush3.bf16.msra.mxu0 %v4335_v29  ;;  %3167 = vmatprep.mubr.msk.f32.mxu0 %vm249_vm3, %v2597_v31 }
0x1673   :  { %3287 = vmatprep.subr.bf16.mxu0 %v3286_v40 }
0x1676   :  { %3289 = vmatpush3.bf16.msra.mxu0 %v3286_v40 }
0x1678   :  { %v2598_v27 = vld [vmem:[#allocation2 + $0x8] sm:$0xff] }
0x1679   :  { %3168 = vmatmul.mubr.msk.f32.vlgmr.msra.gmra.mrb[16].mxu0 %vm249_vm3, %v2598_v27 }
0x174c   :  { %v3169_v51 = vpop.f32.mrb[16].mxu0 }
0x174d   :  { %v2779_v59 = vadd.f32 %v3169_v51, %v2857_v44  ;;  %v2762_v11 = vpop.f32.mrb[17].mxu0 }
0x174e   :  { %v2778_v61 = vadd.f32 %v2857_v44, %v2762_v11 }
0x174f   :  { %2782 = vst.msk [vmem:[#allocation9 + $0x8] sm:$0xff] %vm2780_vm12, %v2779_v59 }
0x1750   :  { %2781 = vst.msk [vmem:[#allocation9] sm:$0xff] %vm2780_vm12, %v2778_v61 }
0x1751   :  { %3613 = shalt.err (!%p3610_p6)
}
0x1752   :  { %s3614_s9 = scalar_lea.hbm %s4417_s10, 256 }
0x1753   :  { %p3615_p7 = scmp.ne.s32.totalorder %s4417_s10, %s3614_s9  ;;  %p3618_p8 = scmp.lt.u32.totalorder %s3614_s9, %s4417_s10 }
0x1755   :  { %p3620_p9 = pnand %p3618_p8, %p3615_p7 }
0x1757   :  { %3623 = shalt.err (!%p3620_p9)
}
0x1758   :  { %2794 = dma.vmem_to_hbm [thread:$0]  %s2789_s16, 256, %s4417_s10, [#allocation6], %s3631_s23, %s3631_s23, %s3632_s24  }
0x1759   :  { %3628 = dma.done.wait [#allocation6], 256  }
0x175a   :  { %3629 = vsyncadd [#allocation6], 4294967040 }
0x175b   :  { %2798 = vsyncpa [#allocation5], 1 }
0x175c   :  { %2799 = vsyncpa [#allocation8], 1 }
0x175d   :  { %2800 = vsyncpa [#allocation6], 1 }

</bundles_post_ra>
